<compile_context>
chip_gen: v5e
topology: v5e:2x2
jax: 0.10.0
libtpu: 0.0.40
codegen_flags: <defaults>
</compile_context>

<pallas_src>
from functools import partial

import jax
import jax.numpy as jnp
from jax.experimental import pallas as pl
from jax.experimental.pallas import tpu as pltpu


def _penalized_sum(d, penalty):
    """sum(|d|) for l1, sum(d*d) for l2 — consumed immediately (short live range)."""
    if penalty == 'l2':
        return jnp.sum(d * d)
    return jnp.sum(jnp.abs(d))


def _store_scalar(ref, val):
    """Store a traced scalar into a (1, 1) VMEM output block."""
    ref[...] = jnp.zeros_like(ref) + val


def grad3d_kernel(x_ref, ody_ref, odx_ref, odz_ref, *, penalty):
    # x_ref: (TB, D, H, W) — TB whole volumes; diffs never cross volumes.
    x = x_ref[...].astype(jnp.float32)

    # dy: along torch dim 2 (D), dx: along dim 3 (H), dz: along dim 4 (W).
    s_dy = _penalized_sum(x[:, 1:, :, :] - x[:, :-1, :, :], penalty)
    s_dx = _penalized_sum(x[:, :, 1:, :] - x[:, :, :-1, :], penalty)
    s_dz = _penalized_sum(x[:, :, :, 1:] - x[:, :, :, :-1], penalty)

    _store_scalar(ody_ref, s_dy)
    _store_scalar(odx_ref, s_dx)
    _store_scalar(odz_ref, s_dz)


def grad3d_loss(y_pred, y_true=None, *, penalty='l1', loss_mult=None,
                max_block_elems=256 * 1024):
    """Matches Grad3d(penalty, loss_mult).forward(y_pred, y_true). y_true unused."""
    del y_true  # unused, exactly like the PyTorch module
    B, C, D, H, W = y_pred.shape
    N = B * C
    vol = D * H * W

    # Free reshape; native dtype goes to the kernel (upcast in-kernel).
    x = y_pred.reshape(N, D, H, W)

    # Largest divisor TB of N whose block stays within the VMEM budget.
    TB = 1
    for t in range(N, 0, -1):
        if N % t == 0 and t * vol <= max_block_elems:
            TB = t
            break
    nb = N // TB

    kern = partial(grad3d_kernel, penalty=penalty)
    s_dy, s_dx, s_dz = pl.pallas_call(
        kern,
        out_shape=(jax.ShapeDtypeStruct((nb, 1), jnp.float32),
                   jax.ShapeDtypeStruct((nb, 1), jnp.float32),
                   jax.ShapeDtypeStruct((nb, 1), jnp.float32)),
        grid=(nb,),
        in_specs=[pl.BlockSpec((TB, D, H, W), lambda i: (i, 0, 0, 0))],
        out_specs=[pl.BlockSpec((1, 1), lambda i: (i, 0)) for _ in range(3)],
        compiler_params=pltpu.CompilerParams(
            dimension_semantics=("parallel",),      # independent per-block outputs
            vmem_limit_bytes=32 * 1024 * 1024,      # explicit; safe on v5e/v6e/v7x
        ),
    )(x)

    # Exact per-direction element counts -> means, then the module's /3 and mult.
    n_dy = float(N * (D - 1) * H * W)
    n_dx = float(N * D * (H - 1) * W)
    n_dz = float(N * D * H * (W - 1))
    d = jnp.sum(s_dx) / n_dx + jnp.sum(s_dy) / n_dy + jnp.sum(s_dz) / n_dz
    grad = d / 3.0
    if loss_mult is not None:
        grad = grad * loss_mult
    return grad


def grad3d_reference(y_pred, y_true=None, penalty='l1', loss_mult=None):
    """Pure-JAX replica of the PyTorch forward (for verification)."""
    del y_true
    x = y_pred.astype(jnp.float32)
    dy = jnp.abs(x[:, :, 1:, :, :] - x[:, :, :-1, :, :])
    dx = jnp.abs(x[:, :, :, 1:, :] - x[:, :, :, :-1, :])
    dz = jnp.abs(x[:, :, :, :, 1:] - x[:, :, :, :, :-1])
    if penalty == 'l2':
        dy, dx, dz = dy * dy, dx * dx, dz * dz
    d = jnp.mean(dx) + jnp.mean(dy) + jnp.mean(dz)
    grad = d / 3.0
    if loss_mult is not None:
        grad = grad * loss_mult
    return grad


if __name__ == "__main__":
    key = jax.random.PRNGKey(0)
    k1, k2 = jax.random.split(key)
    # Grad3d runs on 5-D flow fields [B, C, D, H, W]; small demo shapes.
    y_pred = jax.random.normal(k1, (2, 3, 8, 16, 16), dtype=jnp.float32)
    y_true = jax.random.normal(k2, (2, 3, 8, 16, 16), dtype=jnp.float32)  # unused

    # Default module config: penalty='l1', loss_mult=None.
    out = jax.block_until_ready(grad3d_loss(y_pred, y_true))
    ref = jax.block_until_ready(grad3d_reference(y_pred, y_true))
    assert jnp.allclose(out, ref, rtol=1e-4, atol=1e-5), (out, ref)

    # Also exercise the l2 + loss_mult path.
    out2 = jax.block_until_ready(
        grad3d_loss(y_pred, y_true, penalty='l2', loss_mult=2.0))
    ref2 = jax.block_until_ready(
        grad3d_reference(y_pred, y_true, penalty='l2', loss_mult=2.0))
    assert jnp.allclose(out2, ref2, rtol=1e-4, atol=1e-5), (out2, ref2)

    print("KERNEL_OK")
</pallas_src>

<mosaic_0001>
module attributes {stable_mosaic.version = 11 : i64} {
  func.func @grad3d_kernel(%arg0: i32, %arg1: memref<6x8x16x16xf32, #tpu.memory_space<vmem>>, %arg2: memref<1x1xf32, #tpu.memory_space<vmem>>, %arg3: memref<1x1xf32, #tpu.memory_space<vmem>>, %arg4: memref<1x1xf32, #tpu.memory_space<vmem>>) attributes {dimension_semantics = [#tpu.dimension_semantics<parallel>], iteration_bounds = array<i64: 1>, scalar_prefetch = 0 : i64, scratch_operands = 0 : i64, tpu.core_type = #tpu.core_type<tc>, window_params = [{transform_indices = @transform_0, window_bounds = array<i64: 6, 8, 16, 16>}, {transform_indices = @transform_1, window_bounds = array<i64: 1, 1>}, {transform_indices = @transform_2, window_bounds = array<i64: 1, 1>}, {transform_indices = @transform_3, window_bounds = array<i64: 1, 1>}]} {
    %c0 = arith.constant 0 : index
    %c0_0 = arith.constant 0 : index
    %c0_1 = arith.constant 0 : index
    %c0_2 = arith.constant 0 : index
    %0 = vector.load %arg1[%c0, %c0_0, %c0_1, %c0_2] : memref<6x8x16x16xf32, #tpu.memory_space<vmem>>, vector<6x8x16x16xf32>
    %1 = vector.extract_strided_slice %0 {offsets = [0, 1, 0, 0], sizes = [6, 7, 16, 16], strides = [1, 1, 1, 1]} : vector<6x8x16x16xf32> to vector<6x7x16x16xf32>
    %2 = vector.extract_strided_slice %0 {offsets = [0, 0, 0, 0], sizes = [6, 7, 16, 16], strides = [1, 1, 1, 1]} : vector<6x8x16x16xf32> to vector<6x7x16x16xf32>
    %3 = arith.subf %1, %2 : vector<6x7x16x16xf32>
    %4 = math.absf %3 : vector<6x7x16x16xf32>
    %5 = vector.shape_cast %4 : vector<6x7x16x16xf32> to vector<1x6x7x16x16xf32>
    %cst = arith.constant dense<0.000000e+00> : vector<1xf32>
    %6 = vector.multi_reduction <add>, %5, %cst [1, 2, 3, 4] : vector<1x6x7x16x16xf32> to vector<1xf32>
    %7 = vector.shape_cast %6 : vector<1xf32> to vector<1x1x1x1x1xf32>
    %8 = vector.extract %7[0, 0, 0, 0, 0] : f32 from vector<1x1x1x1x1xf32>
    %9 = vector.extract_strided_slice %0 {offsets = [0, 0, 1, 0], sizes = [6, 8, 15, 16], strides = [1, 1, 1, 1]} : vector<6x8x16x16xf32> to vector<6x8x15x16xf32>
    %10 = vector.extract_strided_slice %0 {offsets = [0, 0, 0, 0], sizes = [6, 8, 15, 16], strides = [1, 1, 1, 1]} : vector<6x8x16x16xf32> to vector<6x8x15x16xf32>
    %11 = arith.subf %9, %10 : vector<6x8x15x16xf32>
    %12 = math.absf %11 : vector<6x8x15x16xf32>
    %13 = vector.shape_cast %12 : vector<6x8x15x16xf32> to vector<1x6x8x15x16xf32>
    %cst_3 = arith.constant dense<0.000000e+00> : vector<1xf32>
    %14 = vector.multi_reduction <add>, %13, %cst_3 [1, 2, 3, 4] : vector<1x6x8x15x16xf32> to vector<1xf32>
    %15 = vector.shape_cast %14 : vector<1xf32> to vector<1x1x1x1x1xf32>
    %16 = vector.extract %15[0, 0, 0, 0, 0] : f32 from vector<1x1x1x1x1xf32>
    %17 = vector.extract_strided_slice %0 {offsets = [0, 0, 0, 1], sizes = [6, 8, 16, 15], strides = [1, 1, 1, 1]} : vector<6x8x16x16xf32> to vector<6x8x16x15xf32>
    %18 = vector.extract_strided_slice %0 {offsets = [0, 0, 0, 0], sizes = [6, 8, 16, 15], strides = [1, 1, 1, 1]} : vector<6x8x16x16xf32> to vector<6x8x16x15xf32>
    %19 = arith.subf %17, %18 : vector<6x8x16x15xf32>
    %20 = math.absf %19 : vector<6x8x16x15xf32>
    %21 = vector.shape_cast %20 : vector<6x8x16x15xf32> to vector<1x6x8x16x15xf32>
    %cst_4 = arith.constant dense<0.000000e+00> : vector<1xf32>
    %22 = vector.multi_reduction <add>, %21, %cst_4 [1, 2, 3, 4] : vector<1x6x8x16x15xf32> to vector<1xf32>
    %23 = vector.shape_cast %22 : vector<1xf32> to vector<1x1x1x1x1xf32>
    %24 = vector.extract %23[0, 0, 0, 0, 0] : f32 from vector<1x1x1x1x1xf32>
    %cst_5 = arith.constant 0.000000e+00 : f32
    %25 = vector.broadcast %cst_5 : f32 to vector<1x1xf32>
    %26 = vector.broadcast %8 : f32 to vector<1x1xf32>
    %27 = arith.addf %25, %26 : vector<1x1xf32>
    %c0_6 = arith.constant 0 : index
    %c0_7 = arith.constant 0 : index
    %28 = vector.load %arg2[%c0_6, %c0_7] : memref<1x1xf32, #tpu.memory_space<vmem>>, vector<1x1xf32>
    tpu.vector_store %arg2[%c0_6, %c0_7], %27 {strides = array<i32>} : memref<1x1xf32, #tpu.memory_space<vmem>>, vector<1x1xf32>,
    %cst_8 = arith.constant 0.000000e+00 : f32
    %29 = vector.broadcast %cst_8 : f32 to vector<1x1xf32>
    %30 = vector.broadcast %16 : f32 to vector<1x1xf32>
    %31 = arith.addf %29, %30 : vector<1x1xf32>
    %c0_9 = arith.constant 0 : index
    %c0_10 = arith.constant 0 : index
    %32 = vector.load %arg3[%c0_9, %c0_10] : memref<1x1xf32, #tpu.memory_space<vmem>>, vector<1x1xf32>
    tpu.vector_store %arg3[%c0_9, %c0_10], %31 {strides = array<i32>} : memref<1x1xf32, #tpu.memory_space<vmem>>, vector<1x1xf32>,
    %cst_11 = arith.constant 0.000000e+00 : f32
    %33 = vector.broadcast %cst_11 : f32 to vector<1x1xf32>
    %34 = vector.broadcast %24 : f32 to vector<1x1xf32>
    %35 = arith.addf %33, %34 : vector<1x1xf32>
    %c0_12 = arith.constant 0 : index
    %c0_13 = arith.constant 0 : index
    %36 = vector.load %arg4[%c0_12, %c0_13] : memref<1x1xf32, #tpu.memory_space<vmem>>, vector<1x1xf32>
    tpu.vector_store %arg4[%c0_12, %c0_13], %35 {strides = array<i32>} : memref<1x1xf32, #tpu.memory_space<vmem>>, vector<1x1xf32>,
    return
  }
  func.func @transform_0(%arg0: i32) -> (i32, i32, i32, i32) {
    %c0_i32 = arith.constant 0 : i32
    %c0_i32_0 = arith.constant 0 : i32
    %c0_i32_1 = arith.constant 0 : i32
    %c0_i32_2 = arith.constant 0 : i32
    return %arg0, %c0_i32, %c0_i32_0, %c0_i32_1 : i32, i32, i32, i32
  }
  func.func @transform_1(%arg0: i32) -> (i32, i32) {
    %c0_i32 = arith.constant 0 : i32
    %c0_i32_0 = arith.constant 0 : i32
    return %arg0, %c0_i32 : i32, i32
  }
  func.func @transform_2(%arg0: i32) -> (i32, i32) {
    %c0_i32 = arith.constant 0 : i32
    %c0_i32_0 = arith.constant 0 : i32
    return %arg0, %c0_i32 : i32, i32
  }
  func.func @transform_3(%arg0: i32) -> (i32, i32) {
    %c0_i32 = arith.constant 0 : i32
    %c0_i32_0 = arith.constant 0 : i32
    return %arg0, %c0_i32 : i32, i32
  }
}

</mosaic_0001>

<bundles_post_ra>
// kernel: tpu_custom_call.1
= control target key start
LH: loop header
LB: loop body
LE: loop exit
PB: predicated region body
PF: predicated region fallthrough
CT: control target
= control target key end

     0   :  { %9 = vsyncpa [#allocation3], 0  ;;  %s4483_s0 = inlined_call_operand.hbm [shape: f32[6,8,16,16], index: 0, kind: input, shape index: {}]   ;;  %s4484_s1 = inlined_call_operand.hbm [shape: f32[1,1], index: 1, kind: output, shape index: {0}]   ;;  %s4485_s2 = inlined_call_operand.hbm [shape: f32[1,1], index: 2, kind: output, shape index: {1}]   ;;  %s4486_s3 = inlined_call_operand.hbm [shape: f32[1,1], index: 3, kind: output, shape index: {2}]  }
   0x1   :  { %10 = vsyncpa [#allocation4], 0 }
   0x2   :  { %11 = vsyncpa [#allocation7], 0  ;;  %s16_s14 = sshll.u32 %s4483_s0, 4  ;;  %s2872_s15 = smov [#allocation2]   ;;  %s17_s14 = int_to_ptr.hbm [resolvable:$true] %s16_s14 }
   0x3   :  { %s18_s16 = sshll.u32 %s2872_s15, 4  ;;  %s2873_s17 = smov 128   ;;  %s19_s16 = int_to_ptr.vmem [resolvable:$true] %s18_s16 }
   0x4   :  { %s2874_s18 = smov 8  }
   0x5   :  { %24 = dma.hbm_to_vmem [thread:$0]  %s17_s14, 12288, %s19_s16, [#allocation3], %s2873_s17, %s2873_s17, %s2874_s18  }
   0x6   :  { %2866 = dma.done.wait [#allocation3], 12288  }
   0x7   :  { %2867 = vsyncadd [#allocation3], 4294955008  ;;  %v2903_v0 = vld [vmem:[#allocation2 + $0x20] sm:$0xff]  ;;  %v31_v1 = vld [vmem:[#allocation2 + $0x10] sm:$0xff]  ;;  %vm293_vm0 = vcmask 130048   ;;  %s2875_s19 = smov 1  }
   0x8   :  { %v29_v2 = vld [vmem:[#allocation2] sm:$0xff]  ;;  %1545 = vrot.lane.b32.xlu0 %v2903_v0, %s2875_s19  ;;  %v573_v3 = vrot.slane %v2903_v0, 7  ;;  %1541 = vrot.lane.b32.xlu2 %v31_v1, %s2875_s19  ;;  %v127_v4 = vsub.f32 %v2903_v0, %v31_v1  ;;  %v570_v5 = vrot.slane %v31_v1, 7  ;;  %v32_v7 = vld [vmem:[#allocation2 + $0x18] sm:$0xff]  ;;  %v30_v8 = vld [vmem:[#allocation2 + $0x8] sm:$0xff]  ;;  %vm566_vm1 = vcmask 1040384  }
   0x9   :  { %v125_v6 = vsub.f32 %v31_v1, %v29_v2  ;;  %1537 = vrot.lane.b32.xlu1 %v29_v2, %s2875_s19  ;;  %v567_v9 = vrot.slane %v29_v2, 7  ;;  %v571_v10 = vrot.slane %v32_v7, 7  ;;  %v126_v11 = vsub.f32 %v32_v7, %v30_v8  ;;  %v2914_v24 = vld [vmem:[#allocation2 + $0x58] sm:$0xff]  ;;  %v35_v30 = vld [vmem:[#allocation2 + $0x30] sm:$0xff]  ;;  %v34_v35 = vld [vmem:[#allocation2 + $0x28] sm:$0xff]  ;;  %s2876_s0 = smov 127  }
   0xa   :  { %v811_v12 = vsub.f32 %v2903_v0, %v573_v3  ;;  %v211_v13 = vand.u32 2147483647, %v127_v4  ;;  %v809_v14 = vsub.f32 %v31_v1, %v570_v5  ;;  %v568_v19 = vrot.slane %v30_v8, 7  ;;  %v2924_v44 = vld [vmem:[#allocation2 + $0x70] sm:$0xff]  ;;  %v37_v58 = vld [vmem:[#allocation2 + $0x40] sm:$0xff]  ;;  %v36_v63 = vld [vmem:[#allocation2 + $0x38] sm:$0xff] }
   0xb   :  { %v209_v15 = vand.u32 2147483647, %v125_v6  ;;  %v807_v16 = vsub.f32 %v29_v2, %v567_v9  ;;  %v572_v17 = vsel %vm566_vm1, %v570_v5, %v571_v10  ;;  %v210_v18 = vand.u32 2147483647, %v126_v11  ;;  %s2877_s22 = smov [#allocation6]   ;;  %s2630_s26 = sshll.u32 %s4485_s2, 4  ;;  %s2631_s26 = int_to_ptr.hbm [resolvable:$true] %s2630_s26 }
   0xc   :  { %v905_v20 = vand.u32 2147483647, %v809_v14  ;;  %v810_v22 = vsub.f32 %v32_v7, %v572_v17  ;;  %v569_v26 = vsel %vm566_vm1, %v567_v9, %v568_v19  ;;  %v907_v27 = vand.u32 2147483647, %v811_v12  ;;  %v2940_v12 = vld [vmem:[#allocation2 + $0x50] sm:$0xff]  ;;  %s2628_s23 = sshll.u32 %s2877_s22, 4  ;;  %s2629_s23 = int_to_ptr.vmem [resolvable:$true] %s2628_s23 }
   0xd   :  { %v294_v21 = vsel %vm293_vm0, %v209_v15, 0.0  ;;  %v903_v23 = vand.u32 2147483647, %v807_v16  ;;  %v295_v25 = vsel %vm293_vm0, %v210_v18, 0.0  ;;  %v297_v32 = vsel %vm293_vm0, %v211_v13, 0.0  ;;  %s2619_s29 = sshll.u32 %s4484_s1, 4  ;;  %s2620_s29 = int_to_ptr.hbm [resolvable:$true] %s2619_s29 }
   0xe   :  { %v906_v28 = vand.u32 2147483647, %v810_v22  ;;  %v296_v29 = vadd.f32 %v295_v25, %v294_v21  ;;  %v1099_v31 = vrot.slane %v905_v20, 1  ;;  %v808_v33 = vsub.f32 %v30_v8, %v569_v26  ;;  %s2878_s30 = smov [#allocation5]   ;;  %s2879_s2 = smov [#allocation8]  }
   0xf   :  { %v129_v34 = vsub.f32 %v35_v30, %v2903_v0  ;;  %v576_v37 = vrot.slane %v35_v30, 7  ;;  %v128_v38 = vsub.f32 %v34_v35, %v32_v7  ;;  %v1096_v39 = vrot.slane %v903_v23, 1  ;;  %s2617_s4 = sshll.u32 %s2878_s30, 4  ;;  %s2639_s5 = sshll.u32 %s2879_s2, 4  ;;  %s2618_s4 = int_to_ptr.vmem [resolvable:$true] %s2617_s4  ;;  %s2640_s5 = int_to_ptr.vmem [resolvable:$true] %s2639_s5 }
  0x10   :  { %1559 = vrot.lane.b32.xlu0 %v2914_v24, %s2875_s19  ;;  %1543 = vrot.lane.b32.xlu2 %v32_v7, %s2875_s19  ;;  %v1100_v36 = vrot.slane %v906_v28, 1  ;;  %v904_v40 = vand.u32 2147483647, %v808_v33  ;;  %v574_v42 = vrot.slane %v34_v35, 7  ;;  %vm1337_vm2 = vcmask 129024   ;;  %s2641_s8 = sshll.u32 %s4486_s3, 4  ;;  %s2642_s8 = int_to_ptr.hbm [resolvable:$true] %s2641_s8 }
  0x11   :  { %1539 = vrot.lane.b32.xlu1 %v30_v8, %s2875_s19  ;;  %v213_v41 = vand.u32 2147483647, %v129_v34  ;;  %vm1095_vm3 = vcmask 1046528   ;;  %v298_v43 = vadd.f32 %v297_v32, %v296_v29  ;;  %v212_v45 = vand.u32 2147483647, %v128_v38 }
  0x12   :  { %v1102_v46 = vrot.slane %v907_v27, 1  ;;  %v1101_v47 = vsel %vm1095_vm3, %v1099_v31, %v1100_v36  ;;  %v1097_v48 = vrot.slane %v904_v40, 1  ;;  %v588_v49 = vrot.slane %v2924_v44, 7  ;;  %v2954_v27 = vld [vmem:[#allocation2 + $0x88] sm:$0xff] }
  0x13   :  { %v1342_v50 = vsel %vm1337_vm2, %v1100_v36, 0.0  ;;  %v813_v51 = vsub.f32 %v35_v30, %v576_v37  ;;  %v299_v52 = vsel %vm293_vm0, %v212_v45, 0.0  ;;  %v575_v53 = vsel %vm566_vm1, %v573_v3, %v574_v42 }
  0x14   :  { %v1098_v54 = vsel %vm1095_vm3, %v1096_v39, %v1097_v48  ;;  %v1338_v55 = vsel %vm1337_vm2, %v1097_v48, 0.0  ;;  %v301_v56 = vsel %vm293_vm0, %v213_v41, 0.0  ;;  %v812_v57 = vsub.f32 %v34_v35, %v575_v53 }
  0x15   :  { %v1340_v59 = vsel %vm293_vm0, %v1101_v47, 0.0  ;;  %v1336_v60 = vsel %vm293_vm0, %v1098_v54, 0.0  ;;  %v300_v61 = vadd.f32 %v299_v52, %v298_v43  ;;  %v131_v62 = vsub.f32 %v37_v58, %v35_v30 }
  0x16   :  { %v1339_v0 = vadd.f32 %v1338_v55, %v1336_v60  ;;  %v908_v1 = vand.u32 2147483647, %v812_v57  ;;  %v579_v2 = vrot.slane %v37_v58, 7  ;;  %v130_v4 = vsub.f32 %v36_v63, %v34_v35  ;;  %v41_v57 = vld [vmem:[#allocation2 + $0x60] sm:$0xff] }
  0x17   :  { %v909_v3 = vand.u32 2147483647, %v813_v51  ;;  %v215_v5 = vand.u32 2147483647, %v131_v62  ;;  %v577_v6 = vrot.slane %v36_v63, 7  ;;  %v302_v7 = vadd.f32 %v301_v56, %v300_v61  ;;  %v42_v62 = vld [vmem:[#allocation2 + $0x68] sm:$0xff] }
  0x18   :  { %1565 = vrot.lane.b32.xlu0 %v2924_v44, %s2875_s19  ;;  %1549 = vrot.lane.b32.xlu2 %v35_v30, %s2875_s19  ;;  %v1341_v8 = vadd.f32 %v1340_v59, %v1339_v0  ;;  %v1103_v9 = vrot.slane %v908_v1, 1  ;;  %v815_v10 = vsub.f32 %v37_v58, %v579_v2  ;;  %v214_v11 = vand.u32 2147483647, %v130_v4  ;;  %v38_v30 = vld [vmem:[#allocation2 + $0x48] sm:$0xff] }
  0x19   :  { %1547 = vrot.lane.b32.xlu1 %v34_v35, %s2875_s19  ;;  %v583_v13 = vrot.slane %v2914_v24, 7  ;;  %v578_v14 = vsel %vm566_vm1, %v576_v37, %v577_v6  ;;  %v133_v15 = vsub.f32 %v2940_v12, %v37_v58  ;;  %v2948_v17 = vsub.f32 %v2924_v44, %v588_v49 }
  0x1a   :  { %v1343_v16 = vadd.f32 %v1342_v50, %v1341_v8  ;;  %v1104_v18 = vsel %vm1095_vm3, %v1102_v46, %v1103_v9  ;;  %v911_v19 = vand.u32 2147483647, %v815_v10  ;;  %v1346_v21 = vsel %vm1337_vm2, %v1103_v9, 0.0 }
  0x1b   :  { %v1344_v20 = vsel %vm293_vm0, %v1104_v18, 0.0  ;;  %v303_v22 = vsel %vm293_vm0, %v214_v11, 0.0  ;;  %v814_v23 = vsub.f32 %v36_v63, %v578_v14  ;;  %v1105_v25 = vrot.slane %v909_v3, 1 }
  0x1c   :  { %v1345_v26 = vadd.f32 %v1344_v20, %v1343_v16  ;;  %v305_v28 = vsel %vm293_vm0, %v215_v5, 0.0  ;;  %v304_v29 = vadd.f32 %v303_v22, %v302_v7  ;;  %v217_v32 = vand.u32 2147483647, %v133_v15  ;;  %v2989_v20 = vld [vmem:[#allocation2 + $0x78] sm:$0xff] }
  0x1d   :  { %v910_v31 = vand.u32 2147483647, %v814_v23  ;;  %v582_v33 = vrot.slane %v2940_v12, 7  ;;  %v132_v34 = vsub.f32 %v38_v30, %v36_v63  ;;  %v1108_v36 = vrot.slane %v911_v19, 1 }
  0x1e   :  { %v1347_v35 = vadd.f32 %v1346_v21, %v1345_v26  ;;  %v134_v37 = vsub.f32 %v2914_v24, %v38_v30  ;;  %v580_v38 = vrot.slane %v38_v30, 7  ;;  %v306_v47 = vadd.f32 %v305_v28, %v304_v29  ;;  %v45_v29 = vld [vmem:[#allocation2 + $0x80] sm:$0xff] }
  0x1f   :  { %v1106_v39 = vrot.slane %v910_v31, 1  ;;  %v584_v40 = vsel %vm566_vm1, %v582_v33, %v583_v13  ;;  %v817_v41 = vsub.f32 %v2940_v12, %v582_v33  ;;  %v216_v42 = vand.u32 2147483647, %v132_v34 }
  0x20   :  { %1571 = vrot.lane.b32.xlu0 %v2954_v27, %s2875_s19  ;;  %1553 = vrot.lane.b32.xlu2 %v37_v58, %s2875_s19  ;;  %v818_v43 = vsub.f32 %v2914_v24, %v584_v40  ;;  %v218_v45 = vand.u32 2147483647, %v134_v37  ;;  %v581_v46 = vsel %vm566_vm1, %v579_v2, %v580_v38  ;;  %v309_v50 = vsel %vm293_vm0, %v217_v32, 0.0 }
  0x21   :  { %1551 = vrot.lane.b32.xlu1 %v36_v63, %s2875_s19  ;;  %v1107_v48 = vsel %vm1095_vm3, %v1105_v25, %v1106_v39  ;;  %v913_v51 = vand.u32 2147483647, %v817_v41  ;;  %v307_v52 = vsel %vm293_vm0, %v216_v42, 0.0  ;;  %v1350_v54 = vsel %vm1337_vm2, %v1106_v39, 0.0  ;;  %v2973_v63 = vld [vmem:[#allocation2 + $0xa0] sm:$0xff] }
  0x22   :  { %v1348_v53 = vsel %vm293_vm0, %v1107_v48, 0.0  ;;  %v914_v55 = vand.u32 2147483647, %v818_v43  ;;  %v816_v56 = vsub.f32 %v38_v30, %v581_v46  ;;  %v311_v60 = vsel %vm293_vm0, %v218_v45, 0.0 }
  0x23   :  { %v1349_v58 = vadd.f32 %v1348_v53, %v1347_v35  ;;  %v1111_v59 = vrot.slane %v913_v51, 1  ;;  %v308_v61 = vadd.f32 %v307_v52, %v306_v47  ;;  %v136_v2 = vsub.f32 %v42_v62, %v2914_v24  ;;  %v2997_v35 = vld [vmem:[#allocation2 + $0xb8] sm:$0xff] }
  0x24   :  { %v1112_v0 = vrot.slane %v914_v55, 1  ;;  %v912_v1 = vand.u32 2147483647, %v816_v56  ;;  %v586_v4 = vrot.slane %v42_v62, 7  ;;  %v135_v6 = vsub.f32 %v41_v57, %v2940_v12 }
  0x25   :  { %v1351_v3 = vadd.f32 %v1350_v54, %v1349_v58  ;;  %v310_v5 = vadd.f32 %v309_v50, %v308_v61  ;;  %v137_v7 = vsub.f32 %v2924_v44, %v41_v57  ;;  %v220_v10 = vand.u32 2147483647, %v136_v2  ;;  %v3012_v44 = vld [vmem:[#allocation2 + $0x98] sm:$0xff]  ;;  %v3016_v61 = vld [vmem:[#allocation2 + $0x90] sm:$0xff] }
  0x26   :  { %v1113_v8 = vsel %vm1095_vm3, %v1111_v59, %v1112_v0  ;;  %v1109_v9 = vrot.slane %v912_v1, 1  ;;  %v585_v11 = vrot.slane %v41_v57, 7  ;;  %v917_v13 = vand.u32 2147483647, %v2948_v17 }
  0x27   :  { %v592_v14 = vrot.slane %v2954_v27, 7  ;;  %v219_v24 = vand.u32 2147483647, %v135_v6  ;;  %v1356_v15 = vsel %vm293_vm0, %v1113_v8, 0.0  ;;  %v312_v18 = vadd.f32 %v311_v60, %v310_v5 }
  0x28   :  { %1577 = vrot.lane.b32.xlu0 %v2973_v63, %s2875_s19  ;;  %1557 = vrot.lane.b32.xlu2 %v2940_v12, %s2875_s19  ;;  %v1110_v16 = vsel %vm1095_vm3, %v1108_v36, %v1109_v9  ;;  %v587_v19 = vsel %vm566_vm1, %v585_v11, %v586_v4  ;;  %v1354_v21 = vsel %vm1337_vm2, %v1109_v9, 0.0  ;;  %v819_v23 = vsub.f32 %v41_v57, %v585_v11  ;;  %v3033_v11 = vld [vmem:[#allocation2 + $0xb0] sm:$0xff] }
  0x29   :  { %1555 = vrot.lane.b32.xlu1 %v38_v30, %s2875_s19  ;;  %v1352_v17 = vsel %vm293_vm0, %v1110_v16, 0.0  ;;  %v313_v22 = vsel %vm293_vm0, %v219_v24, 0.0  ;;  %v315_v25 = vsel %vm293_vm0, %v220_v10, 0.0  ;;  %v221_v26 = vand.u32 2147483647, %v137_v7  ;;  %v3028_v7 = vld [vmem:[#allocation2 + $0xd0] sm:$0xff] }
  0x2a   :  { %v1353_v12 = vadd.f32 %v1352_v17, %v1351_v3  ;;  %v820_v28 = vsub.f32 %v42_v62, %v587_v19  ;;  %v915_v31 = vand.u32 2147483647, %v819_v23  ;;  %v591_v30 = vrot.slane %v45_v29, 7 }
  0x2b   :  { %v138_v32 = vsub.f32 %v2989_v20, %v42_v62  ;;  %v589_v33 = vrot.slane %v2989_v20, 7  ;;  %v314_v36 = vadd.f32 %v313_v22, %v312_v18  ;;  %v1358_v38 = vsel %vm1337_vm2, %v1112_v0, 0.0 }
  0x2c   :  { %v1355_v34 = vadd.f32 %v1354_v21, %v1353_v12  ;;  %v916_v37 = vand.u32 2147483647, %v820_v28  ;;  %v1114_v39 = vrot.slane %v915_v31, 1  ;;  %v593_v40 = vsel %vm566_vm1, %v591_v30, %v592_v14 }
  0x2d   :  { %v823_v41 = vsub.f32 %v45_v29, %v591_v30  ;;  %v222_v42 = vand.u32 2147483647, %v138_v32  ;;  %v597_v43 = vrot.slane %v2973_v63, 7  ;;  %v824_v46 = vsub.f32 %v2954_v27, %v593_v40  ;;  %v3057_v40 = vld [vmem:[#allocation2 + $0xe8] sm:$0xff] }
  0x2e   :  { %v1357_v45 = vadd.f32 %v1356_v15, %v1355_v34  ;;  %v590_v47 = vsel %vm566_vm1, %v588_v49, %v589_v33  ;;  %v317_v48 = vsel %vm293_vm0, %v221_v26, 0.0  ;;  %v1115_v52 = vrot.slane %v916_v37, 1 }
  0x2f   :  { %v919_v50 = vand.u32 2147483647, %v823_v41  ;;  %v822_v51 = vsub.f32 %v2989_v20, %v590_v47  ;;  %v1117_v53 = vrot.slane %v917_v13, 1  ;;  %v920_v54 = vand.u32 2147483647, %v824_v46 }
  0x30   :  { %1583 = vrot.lane.b32.xlu0 %v2997_v35, %s2875_s19  ;;  %1563 = vrot.lane.b32.xlu2 %v42_v62, %s2875_s19  ;;  %v316_v55 = vadd.f32 %v315_v25, %v314_v36  ;;  %v1359_v56 = vadd.f32 %v1358_v38, %v1357_v45  ;;  %v319_v58 = vsel %vm293_vm0, %v222_v42, 0.0  ;;  %v1116_v60 = vsel %vm1095_vm3, %v1114_v39, %v1115_v52  ;;  %v50_v39 = vld [vmem:[#allocation2 + $0xa8] sm:$0xff] }
  0x31   :  { %1561 = vrot.lane.b32.xlu1 %v41_v57, %s2875_s19  ;;  %v1120_v49 = vrot.slane %v919_v50, 1  ;;  %v918_v59 = vand.u32 2147483647, %v822_v51  ;;  %v1121_v62 = vrot.slane %v920_v54, 1  ;;  %v1360_v0 = vsel %vm293_vm0, %v1116_v60, 0.0 }
  0x32   :  { %v1362_v1 = vsel %vm1337_vm2, %v1115_v52, 0.0  ;;  %v318_v2 = vadd.f32 %v317_v48, %v316_v55  ;;  %v3023_v57 = vsub.f32 %v2973_v63, %v597_v43  ;;  %v1361_v3 = vadd.f32 %v1360_v0, %v1359_v56 }
  0x33   :  { %v1118_v4 = vrot.slane %v918_v59, 1  ;;  %v140_v5 = vsub.f32 %v3012_v44, %v2954_v27  ;;  %v601_v6 = vrot.slane %v2997_v35, 7  ;;  %v1122_v8 = vsel %vm1095_vm3, %v1120_v49, %v1121_v62  ;;  %v3071_v59 = vld [vmem:[#allocation2 + $0xc8] sm:$0xff] }
  0x34   :  { %v595_v9 = vrot.slane %v3012_v44, 7  ;;  %v139_v10 = vsub.f32 %v3016_v61, %v45_v29  ;;  %v320_v24 = vadd.f32 %v319_v58, %v318_v2  ;;  %v1363_v15 = vadd.f32 %v1362_v1, %v1361_v3 }
  0x35   :  { %v1119_v13 = vsel %vm1095_vm3, %v1117_v53, %v1118_v4  ;;  %v1366_v14 = vsel %vm1337_vm2, %v1118_v4, 0.0  ;;  %v224_v16 = vand.u32 2147483647, %v140_v5  ;;  %v141_v18 = vsub.f32 %v2973_v63, %v3016_v61 }
  0x36   :  { %v1364_v27 = vsel %vm293_vm0, %v1119_v13, 0.0  ;;  %v223_v19 = vand.u32 2147483647, %v139_v10  ;;  %v1368_v17 = vsel %vm293_vm0, %v1122_v8, 0.0  ;;  %v594_v22 = vrot.slane %v3016_v61, 7  ;;  %v53_v8 = vld [vmem:[#allocation2 + $0xc0] sm:$0xff] }
  0x37   :  { %v1365_v21 = vadd.f32 %v1364_v27, %v1363_v15  ;;  %v143_v23 = vsub.f32 %v3033_v11, %v2973_v63  ;;  %v323_v12 = vsel %vm293_vm0, %v224_v16, 0.0  ;;  %v225_v25 = vand.u32 2147483647, %v141_v18  ;;  %v3086_v13 = vld [vmem:[#allocation2 + $0x100] sm:$0xff] }
  0x38   :  { %1589 = vrot.lane.b32.xlu0 %v3028_v7, %s2875_s19  ;;  %1569 = vrot.lane.b32.xlu2 %v45_v29, %s2875_s19  ;;  %v321_v26 = vsel %vm293_vm0, %v223_v19, 0.0  ;;  %v600_v28 = vrot.slane %v3033_v11, 7  ;;  %v596_v30 = vsel %vm566_vm1, %v594_v22, %v595_v9  ;;  %v825_v29 = vsub.f32 %v3016_v61, %v594_v22  ;;  %v3093_v19 = vld [vmem:[#allocation2 + $0xe0] sm:$0xff] }
  0x39   :  { %1567 = vrot.lane.b32.xlu1 %v2989_v20, %s2875_s19  ;;  %v1367_v31 = vadd.f32 %v1366_v14, %v1365_v21  ;;  %v322_v32 = vadd.f32 %v321_v26, %v320_v24  ;;  %v1370_v33 = vsel %vm1337_vm2, %v1121_v62, 0.0  ;;  %v826_v34 = vsub.f32 %v3012_v44, %v596_v30 }
  0x3a   :  { %v921_v37 = vand.u32 2147483647, %v825_v29  ;;  %v602_v38 = vsel %vm566_vm1, %v600_v28, %v601_v6  ;;  %v325_v41 = vsel %vm293_vm0, %v225_v25, 0.0  ;;  %v227_v45 = vand.u32 2147483647, %v143_v23 }
  0x3b   :  { %v1369_v36 = vadd.f32 %v1368_v17, %v1367_v31  ;;  %v324_v20 = vadd.f32 %v323_v12, %v322_v32  ;;  %v922_v42 = vand.u32 2147483647, %v826_v34  ;;  %v829_v46 = vsub.f32 %v3033_v11, %v600_v28 }
  0x3c   :  { %v923_v47 = vand.u32 2147483647, %v3023_v57  ;;  %v1123_v48 = vrot.slane %v921_v37, 1  ;;  %v830_v50 = vsub.f32 %v2997_v35, %v602_v38  ;;  %v142_v54 = vsub.f32 %v50_v39, %v3012_v44  ;;  %v56_v37 = vld [vmem:[#allocation2 + $0xd8] sm:$0xff] }
  0x3d   :  { %v1371_v51 = vadd.f32 %v1370_v33, %v1369_v36  ;;  %v1124_v52 = vrot.slane %v922_v42, 1  ;;  %v925_v53 = vand.u32 2147483647, %v829_v46  ;;  %v326_v55 = vadd.f32 %v325_v41, %v324_v20 }
  0x3e   :  { %v3068_v56 = vand.u32 2147483647, %v830_v50  ;;  %v144_v49 = vsub.f32 %v2997_v35, %v50_v39  ;;  %v598_v58 = vrot.slane %v50_v39, 7  ;;  %v329_v62 = vsel %vm293_vm0, %v227_v45, 0.0 }
  0x3f   :  { %v1125_v60 = vsel %vm1095_vm3, %v1123_v48, %v1124_v52  ;;  %v1129_v0 = vrot.slane %v925_v53, 1  ;;  %v226_v1 = vand.u32 2147483647, %v142_v54  ;;  %v1126_v9 = vrot.slane %v923_v47, 1  ;;  %v3115_v48 = vld [vmem:[#allocation2 + $0x118] sm:$0xff] }
  0x40   :  { %1595 = vrot.lane.b32.xlu0 %v3057_v40, %s2875_s19  ;;  %1575 = vrot.lane.b32.xlu2 %v3012_v44, %s2875_s19  ;;  %v1372_v2 = vsel %vm293_vm0, %v1125_v60, 0.0  ;;  %v1130_v44 = vrot.slane %v3068_v56, 1  ;;  %v228_v57 = vand.u32 2147483647, %v144_v49  ;;  %v599_v4 = vsel %vm566_vm1, %v597_v43, %v598_v58 }
  0x41   :  { %1573 = vrot.lane.b32.xlu1 %v3016_v61, %s2875_s19  ;;  %v1373_v3 = vadd.f32 %v1372_v2, %v1371_v51  ;;  %v327_v5 = vsel %vm293_vm0, %v226_v1, 0.0  ;;  %v828_v6 = vsub.f32 %v50_v39, %v599_v4  ;;  %v146_v61 = vsub.f32 %v3071_v59, %v2997_v35  ;;  %v59_v4 = vld [vmem:[#allocation2 + $0xf0] sm:$0xff] }
  0x42   :  { %v1374_v10 = vsel %vm1337_vm2, %v1124_v52, 0.0  ;;  %v328_v14 = vadd.f32 %v327_v5, %v326_v55  ;;  %v606_v24 = vrot.slane %v3028_v7, 7  ;;  %v331_v63 = vsel %vm293_vm0, %v228_v57, 0.0  ;;  %v3128_v57 = vld [vmem:[#allocation2 + $0xf8] sm:$0xff] }
  0x43   :  { %v924_v15 = vand.u32 2147483647, %v828_v6  ;;  %v230_v43 = vand.u32 2147483647, %v146_v61  ;;  %v604_v16 = vrot.slane %v3071_v59, 7  ;;  %v145_v18 = vsub.f32 %v53_v8, %v3033_v11 }
  0x44   :  { %v330_v27 = vadd.f32 %v329_v62, %v328_v14  ;;  %v147_v35 = vsub.f32 %v3028_v7, %v53_v8  ;;  %v1375_v17 = vadd.f32 %v1374_v10, %v1373_v3  ;;  %v1131_v21 = vsel %vm1095_vm3, %v1129_v0, %v1130_v44 }
  0x45   :  { %v1127_v22 = vrot.slane %v924_v15, 1  ;;  %v603_v23 = vrot.slane %v53_v8, 7  ;;  %v335_v25 = vsel %vm293_vm0, %v230_v43, 0.0  ;;  %v229_v26 = vand.u32 2147483647, %v145_v18  ;;  %v3141_v43 = vld [vmem:[#allocation2 + $0x130] sm:$0xff] }
  0x46   :  { %v332_v12 = vadd.f32 %v331_v63, %v330_v27  ;;  %v231_v28 = vand.u32 2147483647, %v147_v35  ;;  %v149_v32 = vsub.f32 %v3093_v19, %v3028_v7  ;;  %v1380_v42 = vsel %vm293_vm0, %v1131_v21, 0.0 }
  0x47   :  { %v1128_v31 = vsel %vm1095_vm3, %v1126_v9, %v1127_v22  ;;  %v605_v30 = vsel %vm566_vm1, %v603_v23, %v604_v16  ;;  %v831_v29 = vsub.f32 %v53_v8, %v603_v23  ;;  %v1378_v34 = vsel %vm1337_vm2, %v1127_v22, 0.0 }
  0x48   :  { %1601 = vrot.lane.b32.xlu0 %v3086_v13, %s2875_s19  ;;  %1581 = vrot.lane.b32.xlu2 %v3033_v11, %s2875_s19  ;;  %v1376_v33 = vsel %vm293_vm0, %v1128_v31, 0.0  ;;  %v333_v11 = vsel %vm293_vm0, %v229_v26, 0.0  ;;  %v832_v36 = vsub.f32 %v3071_v59, %v605_v30  ;;  %v337_v45 = vsel %vm293_vm0, %v231_v28, 0.0 }
  0x49   :  { %1579 = vrot.lane.b32.xlu1 %v50_v39, %s2875_s19  ;;  %v1377_v20 = vadd.f32 %v1376_v33, %v1375_v17  ;;  %v927_v38 = vand.u32 2147483647, %v831_v29  ;;  %v334_v41 = vadd.f32 %v333_v11, %v332_v12  ;;  %v833_v39 = vsub.f32 %v3028_v7, %v606_v24  ;;  %v3146_v7 = vld [vmem:[#allocation2 + $0x110] sm:$0xff]  ;;  %v62_v33 = vld [vmem:[#allocation2 + $0x108] sm:$0xff] }
  0x4a   :  { %v928_v46 = vand.u32 2147483647, %v832_v36  ;;  %v148_v52 = vsub.f32 %v56_v37, %v3071_v59  ;;  %v610_v53 = vrot.slane %v3057_v40, 7  ;;  %v233_v55 = vand.u32 2147483647, %v149_v32 }
  0x4b   :  { %v1379_v47 = vadd.f32 %v1378_v34, %v1377_v20  ;;  %v1132_v50 = vrot.slane %v927_v38, 1  ;;  %v336_v51 = vadd.f32 %v335_v25, %v334_v41  ;;  %v609_v56 = vrot.slane %v3093_v19, 7 }
  0x4c   :  { %v1133_v54 = vrot.slane %v928_v46, 1  ;;  %v1382_v58 = vsel %vm1337_vm2, %v1130_v44, 0.0  ;;  %v150_v0 = vsub.f32 %v3057_v40, %v56_v37  ;;  %v929_v1 = vand.u32 2147483647, %v833_v39 }
  0x4d   :  { %v1381_v49 = vadd.f32 %v1380_v42, %v1379_v47  ;;  %v338_v62 = vadd.f32 %v337_v45, %v336_v51  ;;  %v232_v2 = vand.u32 2147483647, %v148_v52  ;;  %v341_v44 = vsel %vm293_vm0, %v233_v55, 0.0  ;;  %v3162_v45 = vld [vmem:[#allocation2 + $0x148] sm:$0xff] }
  0x4e   :  { %v1134_v60 = vsel %vm1095_vm3, %v1132_v50, %v1133_v54  ;;  %v611_v3 = vsel %vm566_vm1, %v609_v56, %v610_v53  ;;  %v234_v5 = vand.u32 2147483647, %v150_v0  ;;  %v607_v6 = vrot.slane %v56_v37, 7  ;;  %v3166_v53 = vld [vmem:[#allocation2 + $0x128] sm:$0xff] }
  0x4f   :  { %v1383_v61 = vadd.f32 %v1382_v58, %v1381_v49  ;;  %v835_v9 = vsub.f32 %v3093_v19, %v609_v56  ;;  %v339_v10 = vsel %vm293_vm0, %v232_v2, 0.0  ;;  %v152_v63 = vsub.f32 %v3128_v57, %v3057_v40 }
  0x50   :  { %1607 = vrot.lane.b32.xlu0 %v3115_v48, %s2875_s19  ;;  %1587 = vrot.lane.b32.xlu2 %v3071_v59, %s2875_s19  ;;  %v1384_v59 = vsel %vm293_vm0, %v1134_v60, 0.0  ;;  %v340_v14 = vadd.f32 %v339_v10, %v338_v62  ;;  %v151_v15 = vsub.f32 %v59_v4, %v3093_v19  ;;  %v836_v27 = vsub.f32 %v3057_v40, %v611_v3  ;;  %v3187_v10 = vld [vmem:[#allocation2 + $0x160] sm:$0xff] }
  0x51   :  { %1585 = vrot.lane.b32.xlu1 %v53_v8, %s2875_s19  ;;  %v608_v8 = vsel %vm566_vm1, %v606_v24, %v607_v6  ;;  %v613_v18 = vrot.slane %v3128_v57, 7  ;;  %v343_v17 = vsel %vm293_vm0, %v234_v5, 0.0  ;;  %v612_v21 = vrot.slane %v59_v4, 7 }
  0x52   :  { %v834_v16 = vsub.f32 %v56_v37, %v608_v8  ;;  %v235_v35 = vand.u32 2147483647, %v151_v15  ;;  %v1135_v24 = vrot.slane %v929_v1, 1  ;;  %v1385_v22 = vadd.f32 %v1384_v59, %v1383_v61 }
  0x53   :  { %v342_v12 = vadd.f32 %v341_v44, %v340_v14  ;;  %v1386_v25 = vsel %vm1337_vm2, %v1133_v54, 0.0  ;;  %v931_v26 = vand.u32 2147483647, %v835_v9  ;;  %v236_v40 = vand.u32 2147483647, %v152_v63 }
  0x54   :  { %v930_v23 = vand.u32 2147483647, %v834_v16  ;;  %v345_v28 = vsel %vm293_vm0, %v235_v35, 0.0  ;;  %v932_v31 = vand.u32 2147483647, %v836_v27  ;;  %v153_v32 = vsub.f32 %v3146_v7, %v3086_v13 }
  0x55   :  { %v344_v29 = vadd.f32 %v343_v17, %v342_v12  ;;  %v614_v34 = vsel %vm566_vm1, %v612_v21, %v613_v18  ;;  %v1387_v36 = vadd.f32 %v1386_v25, %v1385_v22  ;;  %v347_v38 = vsel %vm293_vm0, %v236_v40, 0.0 }
  0x56   :  { %v1136_v30 = vrot.slane %v930_v23, 1  ;;  %v237_v41 = vand.u32 2147483647, %v153_v32  ;;  %v154_v39 = vsub.f32 %v3115_v48, %v62_v33  ;;  %v1138_v42 = vrot.slane %v931_v26, 1  ;;  %v3202_v23 = vld [vmem:[#allocation2 + $0x140] sm:$0xff] }
  0x57   :  { %v346_v20 = vadd.f32 %v345_v28, %v344_v29  ;;  %v837_v46 = vsub.f32 %v59_v4, %v612_v21  ;;  %v838_v47 = vsub.f32 %v3128_v57, %v614_v34  ;;  %v615_v50 = vrot.slane %v3086_v13, 7 }
  0x58   :  { %1613 = vrot.lane.b32.xlu0 %v3141_v43, %s2875_s19  ;;  %1593 = vrot.lane.b32.xlu2 %v3093_v19, %s2875_s19  ;;  %v1137_v11 = vsel %vm1095_vm3, %v1135_v24, %v1136_v30  ;;  %v1390_v54 = vsel %vm1337_vm2, %v1136_v30, 0.0  ;;  %v349_v55 = vsel %vm293_vm0, %v237_v41, 0.0  ;;  %v238_v56 = vand.u32 2147483647, %v154_v39 }
  0x59   :  { %1591 = vrot.lane.b32.xlu1 %v56_v37, %s2875_s19  ;;  %v1388_v19 = vsel %vm293_vm0, %v1137_v11, 0.0  ;;  %v1139_v37 = vrot.slane %v932_v31, 1  ;;  %v348_v52 = vadd.f32 %v347_v38, %v346_v20  ;;  %v616_v49 = vrot.slane %v62_v33, 7 }
  0x5a   :  { %v1389_v51 = vadd.f32 %v1388_v19, %v1387_v36  ;;  %v933_v60 = vand.u32 2147483647, %v837_v46  ;;  %v934_v62 = vand.u32 2147483647, %v838_v47  ;;  %v156_v2 = vsub.f32 %v3166_v53, %v3115_v48  ;;  %v3213_v36 = vld [vmem:[#allocation2 + $0x178] sm:$0xff] }
  0x5b   :  { %v1140_v58 = vsel %vm1095_vm3, %v1138_v42, %v1139_v37  ;;  %v617_v1 = vsel %vm566_vm1, %v615_v50, %v616_v49  ;;  %v350_v3 = vadd.f32 %v349_v55, %v348_v52  ;;  %v839_v5 = vsub.f32 %v3086_v13, %v615_v50  ;;  %v3215_v19 = vld [vmem:[#allocation2 + $0x138] sm:$0xff] }
  0x5c   :  { %v1391_v44 = vadd.f32 %v1390_v54, %v1389_v51  ;;  %v619_v6 = vrot.slane %v3115_v48, 7  ;;  %v1392_v61 = vsel %vm293_vm0, %v1140_v58, 0.0  ;;  %v351_v59 = vsel %vm293_vm0, %v238_v56, 0.0 }
  0x5d   :  { %v1142_v9 = vrot.slane %v934_v62, 1  ;;  %v618_v8 = vrot.slane %v3146_v7, 7  ;;  %v840_v14 = vsub.f32 %v62_v33, %v617_v1  ;;  %v240_v63 = vand.u32 2147483647, %v156_v2 }
  0x5e   :  { %v1393_v27 = vadd.f32 %v1392_v61, %v1391_v44  ;;  %v352_v16 = vadd.f32 %v351_v59, %v350_v3  ;;  %v1394_v18 = vsel %vm1337_vm2, %v1139_v37, 0.0  ;;  %v935_v17 = vand.u32 2147483647, %v839_v5  ;;  %v3238_v3 = vld [vmem:[#allocation2 + $0x150] sm:$0xff] }
  0x5f   :  { %v620_v24 = vsel %vm566_vm1, %v618_v8, %v619_v6  ;;  %v936_v22 = vand.u32 2147483647, %v840_v14  ;;  %v355_v12 = vsel %vm293_vm0, %v240_v63, 0.0  ;;  %v841_v28 = vsub.f32 %v3146_v7, %v618_v8 }
  0x60   :  { %1619 = vrot.lane.b32.xlu0 %v3162_v45, %s2875_s19  ;;  %1599 = vrot.lane.b32.xlu2 %v3128_v57, %s2875_s19  ;;  %v3181_v57 = vld [vmem:[#allocation2 + $0x120] sm:$0xff]  ;;  %v1395_v40 = vadd.f32 %v1394_v18, %v1393_v27  ;;  %v842_v29 = vsub.f32 %v3115_v48, %v620_v24  ;;  %v1144_v34 = vrot.slane %v935_v17, 1  ;;  %v622_v38 = vrot.slane %v3166_v53, 7 }
  0x61   :  { %1597 = vrot.lane.b32.xlu1 %v59_v4, %s2875_s19  ;;  %v1141_v4 = vrot.slane %v933_v60, 1  ;;  %v155_v15 = vsub.f32 %v3181_v57, %v3146_v7  ;;  %v157_v13 = vsub.f32 %v3141_v43, %v3181_v57  ;;  %v1145_v11 = vrot.slane %v936_v22, 1  ;;  %v3233_v60 = vld [vmem:[#allocation2 + $0x158] sm:$0xff] }
  0x62   :  { %v3176_v0 = vpop.permute.xlu2 %1541  ;;  %v621_v41 = vrot.slane %v3181_v57, 7  ;;  %v937_v48 = vand.u32 2147483647, %v841_v28  ;;  %v1398_v42 = vsel %vm1337_vm2, %v1142_v9, 0.0  ;;  %v938_v37 = vand.u32 2147483647, %v842_v29 }
  0x63   :  { %v239_v35 = vand.u32 2147483647, %v155_v15  ;;  %v1143_v21 = vsel %vm1095_vm3, %v1141_v4, %v1142_v9  ;;  %v241_v25 = vand.u32 2147483647, %v157_v13  ;;  %v158_v47 = vsub.f32 %v3215_v19, %v3166_v53  ;;  %v3249_v15 = vld [vmem:[#allocation2 + $0x190] sm:$0xff] }
  0x64   :  { %v1396_v30 = vsel %vm293_vm0, %v1143_v21, 0.0  ;;  %v1146_v50 = vsel %vm1095_vm3, %v1144_v34, %v1145_v11  ;;  %v160_v52 = vsub.f32 %v3162_v45, %v3215_v19  ;;  %v623_v54 = vsel %vm566_vm1, %v621_v41, %v622_v38 }
  0x65   :  { %v353_v26 = vsel %vm293_vm0, %v239_v35, 0.0  ;;  %v1397_v39 = vadd.f32 %v1396_v30, %v1395_v40  ;;  %v242_v55 = vand.u32 2147483647, %v158_v47  ;;  %v1147_v56 = vrot.slane %v937_v48, 1 }
  0x66   :  { %v354_v31 = vadd.f32 %v353_v26, %v352_v16  ;;  %v244_v58 = vand.u32 2147483647, %v160_v52  ;;  %v1148_v62 = vrot.slane %v938_v37, 1  ;;  %v1400_v1 = vsel %vm293_vm0, %v1146_v50, 0.0 }
  0x67   :  { %v1399_v49 = vadd.f32 %v1398_v42, %v1397_v39  ;;  %v359_v44 = vsel %vm293_vm0, %v242_v55, 0.0  ;;  %v843_v5 = vsub.f32 %v3181_v57, %v621_v41  ;;  %v844_v6 = vsub.f32 %v3166_v53, %v623_v54  ;;  %v3273_v41 = vld [vmem:[#allocation2 + $0x170] sm:$0xff] }
  0x68   :  { %1625 = vrot.lane.b32.xlu0 %v3187_v10, %s2875_s19  ;;  %1605 = vrot.lane.b32.xlu2 %v3146_v7, %s2875_s19  ;;  %v356_v20 = vadd.f32 %v355_v12, %v354_v31  ;;  %v357_v7 = vsel %vm293_vm0, %v241_v25, 0.0  ;;  %v624_v59 = vrot.slane %v3141_v43, 7  ;;  %v363_v9 = vsel %vm293_vm0, %v244_v58, 0.0 }
  0x69   :  { %1603 = vrot.lane.b32.xlu1 %v62_v33, %s2875_s19  ;;  %v159_v33 = vsub.f32 %v3202_v23, %v3141_v43  ;;  %v625_v8 = vrot.slane %v3215_v19, 7  ;;  %v162_v14 = vsub.f32 %v3233_v60, %v3162_v45  ;;  %v1401_v63 = vadd.f32 %v1400_v1, %v1399_v49 }
  0x6a   :  { %v3209_v32 = vpop.permute.xlu2 %1543  ;;  %v358_v51 = vadd.f32 %v357_v7, %v356_v20  ;;  %v1402_v27 = vsel %vm1337_vm2, %v1145_v11, 0.0  ;;  %v939_v16 = vand.u32 2147483647, %v843_v5  ;;  %v940_v18 = vand.u32 2147483647, %v844_v6  ;;  %v3271_v7 = vld [vmem:[#allocation2 + $0x1a8] sm:$0xff] }
  0x6b   :  { %4494 = vst [vmem:[#allocation12_spill] sm:$0xff] %v3209_v32  ;;  %v243_v46 = vand.u32 2147483647, %v159_v33  ;;  %v626_v21 = vsel %vm566_vm1, %v624_v59, %v625_v8  ;;  %v246_v24 = vand.u32 2147483647, %v162_v14  ;;  %v163_v22 = vsub.f32 %v3187_v10, %v3238_v3  ;;  %v3302_v8 = vld [vmem:[#allocation2 + $0x1c0] sm:$0xff] }
  0x6c   :  { %v360_v61 = vadd.f32 %v359_v44, %v358_v51  ;;  %v1403_v12 = vadd.f32 %v1402_v27, %v1401_v63  ;;  %v845_v26 = vsub.f32 %v3141_v43, %v624_v59  ;;  %v1150_v28 = vrot.slane %v939_v16, 1  ;;  %v3275_v43 = vld [vmem:[#allocation2 + $0x168] sm:$0xff]  ;;  %v3304_v14 = vld [vmem:[#allocation2 + $0x180] sm:$0xff] }
  0x6d   :  { %v361_v2 = vsel %vm293_vm0, %v243_v46, 0.0  ;;  %v1151_v31 = vrot.slane %v940_v18, 1  ;;  %v846_v30 = vsub.f32 %v3215_v19, %v626_v21  ;;  %v628_v33 = vrot.slane %v3162_v45, 7 }
  0x6e   :  { %v362_v13 = vadd.f32 %v361_v2, %v360_v61  ;;  %v627_v34 = vrot.slane %v3202_v23, 7  ;;  %v367_v11 = vsel %vm293_vm0, %v246_v24, 0.0  ;;  %v247_v20 = vand.u32 2147483647, %v163_v22 }
  0x6f   :  { %v941_v39 = vand.u32 2147483647, %v845_v26  ;;  %v1406_v48 = vsel %vm1337_vm2, %v1148_v62, 0.0  ;;  %v942_v37 = vand.u32 2147483647, %v846_v30  ;;  %v165_v52 = vsub.f32 %v3273_v41, %v3187_v10 }
  0x70   :  { %1631 = vrot.lane.b32.xlu0 %v3213_v36, %s2875_s19  ;;  %1611 = vrot.lane.b32.xlu2 %v3166_v53, %s2875_s19  ;;  %v1149_v53 = vsel %vm1095_vm3, %v1147_v56, %v1148_v62  ;;  %v364_v35 = vadd.f32 %v363_v9, %v362_v13  ;;  %v629_v50 = vsel %vm566_vm1, %v627_v34, %v628_v33  ;;  %v369_v51 = vsel %vm293_vm0, %v247_v20, 0.0  ;;  %v3329_v33 = vld [vmem:[#allocation2 + $0x188] sm:$0xff]  ;;  %v3331_v20 = vld [vmem:[#allocation2 + $0x1d8] sm:$0xff] }
  0x71   :  { %1609 = vrot.lane.b32.xlu1 %v3181_v57, %s2875_s19  ;;  %v161_v57 = vsub.f32 %v3238_v3, %v3202_v23  ;;  %v1404_v40 = vsel %vm293_vm0, %v1149_v53, 0.0  ;;  %v164_v54 = vsub.f32 %v3275_v43, %v3233_v60  ;;  %v1153_v56 = vrot.slane %v941_v39, 1  ;;  %v3335_v39 = vld [vmem:[#allocation2 + $0x198] sm:$0xff] }
  0x72   :  { %v3243_v4 = vpop.permute.xlu2 %1549  ;;  %v1405_v38 = vadd.f32 %v1404_v40, %v1403_v12  ;;  %v847_v58 = vsub.f32 %v3202_v23, %v627_v34  ;;  %v848_v62 = vsub.f32 %v3162_v45, %v629_v50  ;;  %v1154_v1 = vrot.slane %v942_v37, 1 }
  0x73   :  { %4495 = vst [vmem:[#allocation13_spill] sm:$0xff] %v3243_v4  ;;  %v245_v17 = vand.u32 2147483647, %v161_v57  ;;  %v631_v2 = vrot.slane %v3233_v60, 7  ;;  %v630_v5 = vrot.slane %v3238_v3, 7  ;;  %v166_v61 = vsub.f32 %v3213_v36, %v3275_v43 }
  0x74   :  { %v1407_v55 = vadd.f32 %v1406_v48, %v1405_v38  ;;  %v249_v6 = vand.u32 2147483647, %v165_v52  ;;  %v248_v59 = vand.u32 2147483647, %v164_v54  ;;  %v943_v63 = vand.u32 2147483647, %v847_v58 }
  0x75   :  { %v365_v25 = vsel %vm293_vm0, %v245_v17, 0.0  ;;  %v944_v13 = vand.u32 2147483647, %v848_v62  ;;  %v1155_v57 = vsel %vm1095_vm3, %v1153_v56, %v1154_v1  ;;  %v632_v27 = vsel %vm566_vm1, %v630_v5, %v631_v2  ;;  %v3333_v38 = vld [vmem:[#allocation2 + $0x1a0] sm:$0xff] }
  0x76   :  { %v366_v29 = vadd.f32 %v365_v25, %v364_v35  ;;  %v371_v45 = vsel %vm293_vm0, %v248_v59, 0.0  ;;  %v373_v18 = vsel %vm293_vm0, %v249_v6, 0.0  ;;  %v250_v35 = vand.u32 2147483647, %v166_v61 }
  0x77   :  { %v167_v17 = vsub.f32 %v3249_v15, %v3304_v14  ;;  %v1156_v22 = vrot.slane %v943_v63, 1  ;;  %v1412_v12 = vsel %vm293_vm0, %v1155_v57, 0.0  ;;  %v1157_v25 = vrot.slane %v944_v13, 1 }
  0x78   :  { %1637 = vrot.lane.b32.xlu0 %v3249_v15, %s2875_s19  ;;  %1617 = vrot.lane.b32.xlu2 %v3202_v23, %s2875_s19  ;;  %v368_v47 = vadd.f32 %v367_v11, %v366_v29  ;;  %v1410_v23 = vsel %vm1337_vm2, %v1151_v31, 0.0  ;;  %v849_v26 = vsub.f32 %v3238_v3, %v630_v5  ;;  %v850_v40 = vsub.f32 %v3233_v60, %v632_v27 }
  0x79   :  { %1615 = vrot.lane.b32.xlu1 %v3215_v19, %s2875_s19  ;;  %v1152_v19 = vsel %vm1095_vm3, %v1150_v28, %v1151_v31  ;;  %v633_v31 = vrot.slane %v3187_v10, 7  ;;  %v375_v30 = vsel %vm293_vm0, %v250_v35, 0.0  ;;  %v634_v29 = vrot.slane %v3275_v43, 7 }
  0x7a   :  { %v3278_v42 = vpop.permute.xlu2 %1553  ;;  %v1408_v49 = vsel %vm293_vm0, %v1152_v19, 0.0  ;;  %v370_v44 = vadd.f32 %v369_v51, %v368_v47  ;;  %v251_v34 = vand.u32 2147483647, %v167_v17  ;;  %v945_v48 = vand.u32 2147483647, %v849_v26 }
  0x7b   :  { %v3285_v46 = vpop.permute.xlu1 %1537  ;;  %v1409_v9 = vadd.f32 %v1408_v49, %v1407_v55  ;;  %v946_v19 = vand.u32 2147483647, %v850_v40  ;;  %v635_v47 = vsel %vm566_vm1, %v633_v31, %v634_v29  ;;  %v169_v51 = vsub.f32 %v3333_v38, %v3249_v15 }
  0x7c   :  { %4496 = vst [vmem:[#allocation14_spill] sm:$0xff] %v3285_v46  ;;  %v372_v53 = vadd.f32 %v371_v45, %v370_v44  ;;  %v377_v50 = vsel %vm293_vm0, %v251_v34, 0.0  ;;  %v168_v52 = vsub.f32 %v3335_v39, %v3329_v33  ;;  %v851_v55 = vsub.f32 %v3187_v10, %v633_v31 }
  0x7d   :  { %v1411_v21 = vadd.f32 %v1410_v23, %v1409_v9  ;;  %v637_v56 = vrot.slane %v3213_v36, 7  ;;  %v1159_v62 = vrot.slane %v945_v48, 1  ;;  %v852_v2 = vsub.f32 %v3275_v43, %v635_v47  ;;  %v3362_v23 = vld [vmem:[#allocation2 + $0x1f0] sm:$0xff]  ;;  %v3391_v48 = vld [vmem:[#allocation2 + $0x208] sm:$0xff] }
  0x7e   :  { %v374_v28 = vadd.f32 %v373_v18, %v372_v53  ;;  %v636_v6 = vrot.slane %v3273_v41, 7  ;;  %v253_v61 = vand.u32 2147483647, %v169_v51  ;;  %v170_v59 = vsub.f32 %v3271_v7, %v3335_v39 }
  0x7f   :  { %v1413_v11 = vadd.f32 %v1412_v12, %v1411_v21  ;;  %v252_v10 = vand.u32 2147483647, %v168_v52  ;;  %v1418_v63 = vsel %vm1337_vm2, %v1157_v25, 0.0  ;;  %v947_v45 = vand.u32 2147483647, %v851_v55  ;;  %v3375_v21 = vld [vmem:[#allocation2 + $0x1b8] sm:$0xff] }
  0x80   :  { %1643 = vrot.lane.b32.xlu0 %v3271_v7, %s2875_s19  ;;  %1623 = vrot.lane.b32.xlu2 %v3233_v60, %s2875_s19  ;;  %v1158_v60 = vsel %vm1095_vm3, %v1156_v22, %v1157_v25  ;;  %v376_v37 = vadd.f32 %v375_v30, %v374_v28  ;;  %v948_v57 = vand.u32 2147483647, %v852_v2  ;;  %v638_v27 = vsel %vm566_vm1, %v636_v6, %v637_v56  ;;  %v3379_v25 = vld [vmem:[#allocation2 + $0x1b0] sm:$0xff] }
  0x81   :  { %1621 = vrot.lane.b32.xlu1 %v3238_v3, %s2875_s19  ;;  %v1414_v3 = vsel %vm1337_vm2, %v1154_v1, 0.0  ;;  %v1416_v49 = vsel %vm293_vm0, %v1158_v60, 0.0  ;;  %v1160_v1 = vrot.slane %v946_v19, 1  ;;  %v381_v18 = vsel %vm293_vm0, %v253_v61, 0.0 }
  0x82   :  { %v3316_v16 = vpop.permute.xlu2 %1557  ;;  %v1415_v54 = vadd.f32 %v1414_v3, %v1413_v11  ;;  %v378_v5 = vadd.f32 %v377_v50, %v376_v37  ;;  %v254_v35 = vand.u32 2147483647, %v170_v59  ;;  %v853_v12 = vsub.f32 %v3273_v41, %v636_v6 }
  0x83   :  { %v3321_v24 = vpop.permute.xlu1 %1539  ;;  %v1161_v13 = vsel %vm1095_vm3, %v1159_v62, %v1160_v1  ;;  %v1162_v26 = vrot.slane %v947_v45, 1  ;;  %v854_v40 = vsub.f32 %v3213_v36, %v638_v27  ;;  %v1163_v28 = vrot.slane %v948_v57, 1  ;;  %v3415_v57 = vld [vmem:[#allocation2 + $0x1d0] sm:$0xff] }
  0x84   :  { %v1417_v9 = vadd.f32 %v1416_v49, %v1415_v54  ;;  %v1420_v22 = vsel %vm293_vm0, %v1161_v13, 0.0  ;;  %v640_v30 = vrot.slane %v3329_v33, 7  ;;  %v639_v29 = vrot.slane %v3304_v14, 7 }
  0x85   :  { %v383_v11 = vsel %vm293_vm0, %v254_v35, 0.0  ;;  %v172_v3 = vsub.f32 %v3375_v21, %v3271_v7  ;;  %v171_v36 = vsub.f32 %v3379_v25, %v3333_v38  ;;  %v1422_v19 = vsel %vm1337_vm2, %v1160_v1, 0.0 }
  0x86   :  { %v1419_v17 = vadd.f32 %v1418_v63, %v1417_v9  ;;  %v949_v37 = vand.u32 2147483647, %v853_v12  ;;  %v950_v47 = vand.u32 2147483647, %v854_v40  ;;  %v1164_v50 = vsel %vm1095_vm3, %v1162_v26, %v1163_v28 }
  0x87   :  { %v255_v52 = vand.u32 2147483647, %v171_v36  ;;  %v641_v54 = vsel %vm566_vm1, %v639_v29, %v640_v30  ;;  %v256_v55 = vand.u32 2147483647, %v172_v3  ;;  %v173_v56 = vsub.f32 %v3302_v8, %v3379_v25 }
  0x88   :  { %1649 = vrot.lane.b32.xlu0 %v3302_v8, %s2875_s19  ;;  %1629 = vrot.lane.b32.xlu2 %v3273_v41, %s2875_s19  ;;  %v1421_v60 = vadd.f32 %v1420_v22, %v1419_v17  ;;  %v1165_v1 = vrot.slane %v949_v37, 1  ;;  %v1424_v2 = vsel %vm293_vm0, %v1164_v50, 0.0  ;;  %v1166_v6 = vrot.slane %v950_v47, 1 }
  0x89   :  { %1627 = vrot.lane.b32.xlu1 %v3275_v43, %s2875_s19  ;;  %v379_v43 = vsel %vm293_vm0, %v252_v10, 0.0  ;;  %v385_v62 = vsel %vm293_vm0, %v255_v52, 0.0  ;;  %v855_v61 = vsub.f32 %v3304_v14, %v639_v29  ;;  %v856_v59 = vsub.f32 %v3329_v33, %v641_v54  ;;  %v3441_v54 = vld [vmem:[#allocation2 + $0x1e8] sm:$0xff] }
  0x8a   :  { %v3354_v58 = vpop.permute.xlu2 %1563  ;;  %v380_v53 = vadd.f32 %v379_v43, %v378_v5  ;;  %v1423_v49 = vadd.f32 %v1422_v19, %v1421_v60  ;;  %v3408_v5 = vld [vmem:[#allocation2 + $0x1c8] sm:$0xff]  ;;  %v642_v9 = vrot.slane %v3249_v15, 7  ;;  %v643_v63 = vrot.slane %v3335_v39, 7 }
  0x8b   :  { %v3357_v44 = vpop.permute.xlu1 %1547  ;;  %v387_v43 = vsel %vm293_vm0, %v256_v55, 0.0  ;;  %v257_v45 = vand.u32 2147483647, %v173_v56  ;;  %v1426_v27 = vsel %vm1337_vm2, %v1163_v28, 0.0  ;;  %v952_v35 = vand.u32 2147483647, %v856_v59 }
  0x8c   :  { %v382_v31 = vadd.f32 %v381_v18, %v380_v53  ;;  %v1425_v13 = vadd.f32 %v1424_v2, %v1423_v49  ;;  %v174_v53 = vsub.f32 %v3408_v5, %v3375_v21  ;;  %v644_v12 = vsel %vm566_vm1, %v642_v9, %v643_v63 }
  0x8d   :  { %v389_v26 = vsel %vm293_vm0, %v257_v45, 0.0  ;;  %v175_v40 = vsub.f32 %v3415_v57, %v3302_v8  ;;  %v857_v30 = vsub.f32 %v3249_v15, %v642_v9  ;;  %v646_v29 = vrot.slane %v3271_v7, 7  ;;  %v3443_v15 = vld [vmem:[#allocation2 + $0x1e0] sm:$0xff] }
  0x8e   :  { %v384_v51 = vadd.f32 %v383_v11, %v382_v31  ;;  %v258_v28 = vand.u32 2147483647, %v174_v53  ;;  %v1427_v31 = vadd.f32 %v1426_v27, %v1425_v13  ;;  %v1169_v60 = vrot.slane %v952_v35, 1 }
  0x8f   :  { %v858_v36 = vsub.f32 %v3335_v39, %v644_v12  ;;  %v645_v37 = vrot.slane %v3333_v38, 7  ;;  %v259_v47 = vand.u32 2147483647, %v175_v40  ;;  %v176_v50 = vsub.f32 %v3331_v20, %v3408_v5  ;;  %v3467_v40 = vld [vmem:[#allocation2 + $0x200] sm:$0xff] }
  0x90   :  { %1655 = vrot.lane.b32.xlu0 %v3331_v20, %s2875_s19  ;;  %1635 = vrot.lane.b32.xlu2 %v3329_v33, %s2875_s19  ;;  %v386_v10 = vadd.f32 %v385_v62, %v384_v51  ;;  %v951_v33 = vand.u32 2147483647, %v855_v61  ;;  %v391_v51 = vsel %vm293_vm0, %v258_v28, 0.0  ;;  %v953_v55 = vand.u32 2147483647, %v857_v30 }
  0x91   :  { %1633 = vrot.lane.b32.xlu1 %v3304_v14, %s2875_s19  ;;  %v1167_v14 = vsel %vm1095_vm3, %v1165_v1, %v1166_v6  ;;  %v1430_v56 = vsel %vm1337_vm2, %v1166_v6, 0.0  ;;  %v954_v49 = vand.u32 2147483647, %v858_v36  ;;  %v647_v1 = vsel %vm566_vm1, %v645_v37, %v646_v29 }
  0x92   :  { %v3384_v34 = vpop.permute.xlu2 %1569  ;;  %v388_v22 = vadd.f32 %v387_v43, %v386_v10  ;;  %v1428_v11 = vsel %vm293_vm0, %v1167_v14, 0.0  ;;  %v1168_v3 = vrot.slane %v951_v33, 1  ;;  %v393_v61 = vsel %vm293_vm0, %v259_v47, 0.0 }
  0x93   :  { %v3389_v41 = vpop.permute.xlu1 %1551  ;;  %v1429_v52 = vadd.f32 %v1428_v11, %v1427_v31  ;;  %v260_v59 = vand.u32 2147483647, %v176_v50  ;;  %v177_v6 = vsub.f32 %v3443_v15, %v3415_v57  ;;  %v1171_v63 = vrot.slane %v953_v55, 1 }
  0x94   :  { %v390_v19 = vadd.f32 %v389_v26, %v388_v22  ;;  %v859_v45 = vsub.f32 %v3333_v38, %v645_v37  ;;  %v860_v13 = vsub.f32 %v3271_v7, %v647_v1  ;;  %v1172_v53 = vrot.slane %v954_v49, 1  ;;  %v3472_v7 = vld [vmem:[#allocation2 + $0x1f8] sm:$0xff] }
  0x95   :  { %v1431_v10 = vadd.f32 %v1430_v56, %v1429_v52  ;;  %v649_v27 = vrot.slane %v3375_v21, 7  ;;  %v648_v33 = vrot.slane %v3379_v25, 7  ;;  %v395_v35 = vsel %vm293_vm0, %v260_v59, 0.0 }
  0x96   :  { %v392_v62 = vadd.f32 %v391_v51, %v390_v19  ;;  %v178_v22 = vsub.f32 %v3441_v54, %v3331_v20  ;;  %v261_v12 = vand.u32 2147483647, %v177_v6  ;;  %v1434_v28 = vsel %vm1337_vm2, %v1169_v60, 0.0  ;;  %v3481_v19 = vpop.permute.xlu0 %1545 }
  0x97   :  { %v956_v31 = vand.u32 2147483647, %v860_v13  ;;  %v1173_v30 = vsel %vm1095_vm3, %v1171_v63, %v1172_v53  ;;  %v650_v11 = vsel %vm566_vm1, %v648_v33, %v649_v27  ;;  %v179_v36 = vsub.f32 %v3362_v23, %v3443_v15  ;;  %v3495_v63 = vld [vmem:[#allocation2 + $0x218] sm:$0xff] }
  0x98   :  { %1661 = vrot.lane.b32.xlu0 %v3362_v23, %s2875_s19  ;;  %1641 = vrot.lane.b32.xlu2 %v3333_v38, %s2875_s19  ;;  %v394_v14 = vadd.f32 %v393_v61, %v392_v62  ;;  %v955_v38 = vand.u32 2147483647, %v859_v45  ;;  %v651_v47 = vrot.slane %v3302_v8, 7  ;;  %v1436_v51 = vsel %vm293_vm0, %v1173_v30, 0.0 }
  0x99   :  { %1639 = vrot.lane.b32.xlu1 %v3335_v39, %s2875_s19  ;;  %v1170_v39 = vsel %vm1095_vm3, %v1168_v3, %v1169_v60  ;;  %v262_v3 = vand.u32 2147483647, %v178_v22  ;;  %v397_v60 = vsel %vm293_vm0, %v261_v12, 0.0  ;;  %v1175_v55 = vrot.slane %v956_v31, 1 }
  0x9a   :  { %v3420_v18 = vpop.permute.xlu2 %1575  ;;  %v1432_v43 = vsel %vm293_vm0, %v1170_v39, 0.0  ;;  %v396_v29 = vadd.f32 %v395_v35, %v394_v14  ;;  %v1174_v50 = vrot.slane %v955_v38, 1  ;;  %v861_v56 = vsub.f32 %v3379_v25, %v648_v33 }
  0x9b   :  { %v3425_v17 = vpop.permute.xlu1 %1555  ;;  %v1433_v26 = vadd.f32 %v1432_v43, %v1431_v10  ;;  %v862_v39 = vsub.f32 %v3375_v21, %v650_v11  ;;  %v652_v1 = vrot.slane %v3408_v5, 7  ;;  %v399_v61 = vsel %vm293_vm0, %v262_v3, 0.0  ;;  %v3497_v43 = vld [vmem:[#allocation2 + $0x210] sm:$0xff] }
  0x9c   :  { %4497 = vst [vmem:[#allocation15_spill] sm:$0xff] %v3425_v17  ;;  %v398_v62 = vadd.f32 %v397_v60, %v396_v29  ;;  %v263_v59 = vand.u32 2147483647, %v179_v36  ;;  %v180_v6 = vsub.f32 %v3472_v7, %v3441_v54  ;;  %v957_v45 = vand.u32 2147483647, %v861_v56  ;;  %v3525_v56 = vld [vmem:[#allocation2 + $0x230] sm:$0xff] }
  0x9d   :  { %v1435_v37 = vadd.f32 %v1434_v28, %v1433_v26  ;;  %v958_v13 = vand.u32 2147483647, %v862_v39  ;;  %v653_v14 = vsel %vm566_vm1, %v651_v47, %v652_v1  ;;  %v181_v22 = vsub.f32 %v3497_v43, %v3467_v40 }
  0x9e   :  { %v400_v27 = vadd.f32 %v399_v61, %v398_v62  ;;  %v401_v33 = vsel %vm293_vm0, %v263_v59, 0.0  ;;  %v264_v35 = vand.u32 2147483647, %v180_v6  ;;  %v863_v12 = vsub.f32 %v3302_v8, %v651_v47  ;;  %v3513_v31 = vpop.permute.xlu0 %1559 }
  0x9f   :  { %v1437_v10 = vadd.f32 %v1436_v51, %v1435_v37  ;;  %v655_v26 = vrot.slane %v3331_v20, 7  ;;  %v654_v38 = vrot.slane %v3415_v57, 7  ;;  %v1177_v30 = vrot.slane %v957_v45, 1  ;;  %v3523_v51 = vld [vmem:[#allocation2 + $0x220] sm:$0xff] }
  0xa0   :  { %1667 = vrot.lane.b32.xlu0 %v3391_v48, %s2875_s19  ;;  %1647 = vrot.lane.b32.xlu2 %v3375_v21, %s2875_s19  ;;  %v1176_v21 = vsel %vm1095_vm3, %v1174_v50, %v1175_v55  ;;  %v1178_v29 = vrot.slane %v958_v13, 1  ;;  %v864_v11 = vsub.f32 %v3408_v5, %v653_v14  ;;  %v402_v3 = vadd.f32 %v401_v33, %v400_v27 }
  0xa1   :  { %1645 = vrot.lane.b32.xlu1 %v3379_v25, %s2875_s19  ;;  %v1438_v25 = vsel %vm1337_vm2, %v1172_v53, 0.0  ;;  %v1440_v28 = vsel %vm293_vm0, %v1176_v21, 0.0  ;;  %v403_v60 = vsel %vm293_vm0, %v264_v35, 0.0  ;;  %v182_v8 = vsub.f32 %v3495_v63, %v3391_v48 }
  0xa2   :  { %v3452_v2 = vpop.permute.xlu2 %1581  ;;  %v1439_v53 = vadd.f32 %v1438_v25, %v1437_v10  ;;  %v265_v37 = vand.u32 2147483647, %v181_v22  ;;  %v959_v39 = vand.u32 2147483647, %v863_v12  ;;  %v1442_v62 = vsel %vm1337_vm2, %v1175_v55, 0.0 }
  0xa3   :  { %4498 = vst [vmem:[#allocation16_spill] sm:$0xff] %v3452_v2  ;;  %v3457_v9 = vpop.permute.xlu1 %1561  ;;  %v1179_v1 = vsel %vm1095_vm3, %v1177_v30, %v1178_v29  ;;  %v656_v61 = vsel %vm566_vm1, %v654_v38, %v655_v26  ;;  %v960_v59 = vand.u32 2147483647, %v864_v11  ;;  %v404_v6 = vadd.f32 %v403_v60, %v402_v3  ;;  %v3549_v11 = vld [vmem:[#allocation2 + $0x248] sm:$0xff] }
  0xa4   :  { %4499 = vst [vmem:[#allocation17_spill] sm:$0xff] %v3457_v9  ;;  %v1441_v47 = vadd.f32 %v1440_v28, %v1439_v53  ;;  %v266_v10 = vand.u32 2147483647, %v182_v8  ;;  %v183_v25 = vsub.f32 %v3523_v51, %v3497_v43  ;;  %v405_v55 = vsel %vm293_vm0, %v265_v37, 0.0  ;;  %v3556_v8 = vld [vmem:[#allocation2 + $0x240] sm:$0xff] }
  0xa5   :  { %v865_v45 = vsub.f32 %v3415_v57, %v654_v38  ;;  %v1180_v13 = vrot.slane %v959_v39, 1  ;;  %v1444_v27 = vsel %vm293_vm0, %v1179_v1, 0.0  ;;  %v866_v14 = vsub.f32 %v3331_v20, %v656_v61  ;;  %v3567_v1 = vld [vmem:[#allocation2 + $0x238] sm:$0xff] }
  0xa6   :  { %v1443_v21 = vadd.f32 %v1442_v62, %v1441_v47  ;;  %v1181_v33 = vrot.slane %v960_v59, 1  ;;  %v658_v35 = vrot.slane %v3441_v54, 7  ;;  %v657_v22 = vrot.slane %v3443_v15, 7  ;;  %v3547_v30 = vpop.permute.xlu0 %1565 }
  0xa7   :  { %v406_v53 = vadd.f32 %v405_v55, %v404_v6  ;;  %v407_v12 = vsel %vm293_vm0, %v266_v10, 0.0  ;;  %v267_v26 = vand.u32 2147483647, %v183_v25  ;;  %v961_v38 = vand.u32 2147483647, %v865_v45 }
  0xa8   :  { %1653 = vrot.lane.b32.xlu2 %v3415_v57, %s2875_s19  ;;  %v1445_v57 = vadd.f32 %v1444_v27, %v1443_v21  ;;  %v1446_v20 = vsel %vm1337_vm2, %v1178_v29, 0.0  ;;  %v3552_v3 = vand.u32 2147483647, %v866_v14  ;;  %v1182_v37 = vsel %vm1095_vm3, %v1180_v13, %v1181_v33 }
  0xa9   :  { %1651 = vrot.lane.b32.xlu1 %v3408_v5, %s2875_s19  ;;  %v3530_v5 = vld [vmem:[#allocation2 + $0x228] sm:$0xff]  ;;  %v659_v47 = vsel %vm566_vm1, %v657_v22, %v658_v35  ;;  %v408_v62 = vadd.f32 %v407_v12, %v406_v53  ;;  %v409_v29 = vsel %vm293_vm0, %v267_v26, 0.0  ;;  %v185_v61 = vsub.f32 %v3525_v56, %v3523_v51 }
  0xaa   :  { %v3485_v52 = vpop.permute.xlu2 %1587  ;;  %v184_v28 = vsub.f32 %v3530_v5, %v3495_v63  ;;  %v1183_v6 = vrot.slane %v961_v38, 1  ;;  %v1447_v10 = vadd.f32 %v1446_v20, %v1445_v57  ;;  %v1184_v25 = vrot.slane %v3552_v3, 1  ;;  %v3582_v57 = vld [vmem:[#allocation2 + $0x250] sm:$0xff]  ;;  %v3590_v3 = vld [vmem:[#allocation2 + $0x258] sm:$0xff] }
  0xab   :  { %4500 = vst [vmem:[#allocation18_spill] sm:$0xff] %v3485_v52  ;;  %v3489_v49 = vpop.permute.xlu1 %1567  ;;  %v1448_v55 = vsel %vm293_vm0, %v1182_v37, 0.0  ;;  %v867_v21 = vsub.f32 %v3443_v15, %v657_v22  ;;  %v868_v45 = vsub.f32 %v3441_v54, %v659_v47  ;;  %v660_v13 = vrot.slane %v3362_v23, 7  ;;  %v3732_v52 = vld [vmem:[#allocation2 + $0x2d0] sm:$0xff] }
  0xac   :  { %4501 = vst [vmem:[#allocation19_spill] sm:$0xff] %v3489_v49  ;;  %v268_v59 = vand.u32 2147483647, %v184_v28  ;;  %v661_v27 = vrot.slane %v3472_v7, 7  ;;  %v410_v14 = vadd.f32 %v409_v29, %v408_v62  ;;  %v186_v35 = vsub.f32 %v3567_v1, %v3530_v5 }
  0xad   :  { %v269_v53 = vand.u32 2147483647, %v185_v61  ;;  %v1449_v26 = vadd.f32 %v1448_v55, %v1447_v10  ;;  %v187_v28 = vsub.f32 %v3556_v8, %v3525_v56  ;;  %v1450_v22 = vsel %vm1337_vm2, %v1181_v33, 0.0 }
  0xae   :  { %v411_v12 = vsel %vm293_vm0, %v268_v59, 0.0  ;;  %v963_v38 = vand.u32 2147483647, %v867_v21  ;;  %v3588_v20 = vand.u32 2147483647, %v868_v45  ;;  %v3594_v37 = vpop.permute.xlu0 %1571  ;;  %v662_v47 = vsel %vm566_vm1, %v660_v13, %v661_v27 }
  0xaf   :  { %v188_v62 = vsub.f32 %v3549_v11, %v3567_v1  ;;  %v270_v29 = vand.u32 2147483647, %v186_v35  ;;  %v412_v61 = vadd.f32 %v411_v12, %v410_v14  ;;  %v869_v33 = vsub.f32 %v3362_v23, %v660_v13 }
  0xb0   :  { %1659 = vrot.lane.b32.xlu2 %v3441_v54, %s2875_s19  ;;  %v1185_v54 = vsel %vm1095_vm3, %v1183_v6, %v1184_v25  ;;  %v664_v59 = vrot.slane %v3391_v48, 7  ;;  %v663_v6 = vrot.slane %v3467_v40, 7  ;;  %v413_v55 = vsel %vm293_vm0, %v269_v53, 0.0 }
  0xb1   :  { %1657 = vrot.lane.b32.xlu1 %v3443_v15, %s2875_s19  ;;  %v3584_v15 = vld [vmem:[#allocation2 + $0x260] sm:$0xff]  ;;  %v1451_v21 = vadd.f32 %v1450_v22, %v1449_v26  ;;  %v271_v27 = vand.u32 2147483647, %v187_v28  ;;  %v189_v14 = vsub.f32 %v3582_v57, %v3556_v8  ;;  %v1452_v35 = vsel %vm293_vm0, %v1185_v54, 0.0 }
  0xb2   :  { %v3516_v36 = vpop.permute.xlu2 %1593  ;;  %v1186_v12 = vrot.slane %v963_v38, 1  ;;  %v870_v23 = vsub.f32 %v3472_v7, %v662_v47  ;;  %v1187_v13 = vrot.slane %v3588_v20, 1  ;;  %v415_v53 = vsel %vm293_vm0, %v270_v29, 0.0  ;;  %v3623_v20 = vld [vmem:[#allocation2 + $0x278] sm:$0xff] }
  0xb3   :  { %4502 = vst [vmem:[#allocation20_spill] sm:$0xff] %v3516_v36  ;;  %v3521_v50 = vpop.permute.xlu1 %1573  ;;  %v414_v26 = vadd.f32 %v413_v55, %v412_v61  ;;  %v965_v22 = vand.u32 2147483647, %v869_v33  ;;  %v665_v28 = vsel %vm566_vm1, %v663_v6, %v664_v59  ;;  %v1453_v49 = vadd.f32 %v1452_v35, %v1451_v21  ;;  %v3629_v33 = vld [vmem:[#allocation2 + $0x270] sm:$0xff] }
  0xb4   :  { %4503 = vst [vmem:[#allocation21_spill] sm:$0xff] %v3521_v50  ;;  %v272_v50 = vand.u32 2147483647, %v188_v62  ;;  %v417_v54 = vsel %vm293_vm0, %v271_v27, 0.0  ;;  %v273_v38 = vand.u32 2147483647, %v189_v14  ;;  %v1188_v62 = vsel %vm1095_vm3, %v1186_v12, %v1187_v13 }
  0xb5   :  { %v3625_v47 = vand.u32 2147483647, %v870_v23  ;;  %v1454_v29 = vsel %vm1337_vm2, %v1184_v25, 0.0  ;;  %v416_v61 = vadd.f32 %v415_v53, %v414_v26  ;;  %v1189_v27 = vrot.slane %v965_v22, 1 }
  0xb6   :  { %v419_v21 = vsel %vm293_vm0, %v272_v50, 0.0  ;;  %v871_v14 = vsub.f32 %v3467_v40, %v663_v6  ;;  %v872_v25 = vsub.f32 %v3391_v48, %v665_v28  ;;  %v3640_v12 = vpop.permute.xlu0 %1577  ;;  %v1456_v23 = vsel %vm293_vm0, %v1188_v62, 0.0  ;;  %v3651_v48 = vld [vmem:[#allocation2 + $0x290] sm:$0xff] }
  0xb7   :  { %v418_v35 = vadd.f32 %v417_v54, %v416_v61  ;;  %v1455_v53 = vadd.f32 %v1454_v29, %v1453_v49  ;;  %v421_v9 = vsel %vm293_vm0, %v273_v38, 0.0  ;;  %v667_v50 = vrot.slane %v3495_v63, 7  ;;  %v3662_v29 = vld [vmem:[#allocation2 + $0x288] sm:$0xff]  ;;  %v3664_v61 = vld [vmem:[#allocation2 + $0x298] sm:$0xff] }
  0xb8   :  { %1665 = vrot.lane.b32.xlu2 %v3467_v40, %s2875_s19  ;;  %v666_v17 = vrot.slane %v3497_v43, 7  ;;  %v3649_v40 = vld [vmem:[#allocation2 + $0x280] sm:$0xff]  ;;  %v193_v54 = vsub.f32 %v3629_v33, %v3584_v15  ;;  %v967_v38 = vand.u32 2147483647, %v871_v14  ;;  %vm2604_vm4 = vcmask 0  }
  0xb9   :  { %1663 = vrot.lane.b32.xlu1 %v3472_v7, %s2875_s19  ;;  %v191_v7 = vsub.f32 %v3584_v15, %v3582_v57  ;;  %v420_v22 = vadd.f32 %v419_v21, %v418_v35  ;;  %v1457_v21 = vadd.f32 %v1456_v23, %v1455_v53  ;;  %v196_v23 = vsub.f32 %v3664_v61, %v3662_v29 }
  0xba   :  { %v3554_v60 = vpop.permute.xlu2 %1599  ;;  %v668_v32 = vsel %vm566_vm1, %v666_v17, %v667_v50  ;;  %v277_v53 = vand.u32 2147483647, %v193_v54  ;;  %vm2401_vm5 = vcmask 121856  }
  0xbb   :  { %4504 = vst [vmem:[#allocation22_spill] sm:$0xff] %v3554_v60  ;;  %v3562_v39 = vpop.permute.xlu1 %1579  ;;  %v275_v26 = vand.u32 2147483647, %v191_v7  ;;  %v422_v62 = vadd.f32 %v421_v9, %v420_v22  ;;  %v3682_v22 = vld [vmem:[#allocation2 + $0x2a8] sm:$0xff]  ;;  %v3690_v60 = vld [vmem:[#allocation2 + $0x2b0] sm:$0xff] }
  0xbc   :  { %4505 = vst [vmem:[#allocation23_spill] sm:$0xff] %v3562_v39  ;;  %v190_v39 = vsub.f32 %v3590_v3, %v3549_v11 }
  0xbd   :  { %4510 = vst [vmem:[#allocation28_spill] sm:$0xff] %v3690_v60 }
  0xbe   :  { %v274_v55 = vand.u32 2147483647, %v190_v39  ;;  %v1190_v39 = vrot.slane %v3625_v47, 1  ;;  %v3660_v47 = vand.u32 2147483647, %v872_v25  ;;  %v3672_v25 = vld [vmem:[#allocation2 + $0x2a0] sm:$0xff] }
  0xc0   :  { %1671 = vrot.lane.b32.xlu2 %v3495_v63, %s2875_s19  ;;  %v423_v28 = vsel %vm293_vm0, %v274_v55, 0.0  ;;  %v195_v55 = vsub.f32 %v3651_v48, %v3649_v40  ;;  %v1191_v35 = vsel %vm1095_vm3, %v1189_v27, %v1190_v39  ;;  %v1192_v27 = vrot.slane %v967_v38, 1 }
  0xc1   :  { %1669 = vrot.lane.b32.xlu1 %v3497_v43, %s2875_s19  ;;  %v424_v14 = vadd.f32 %v423_v28, %v422_v62  ;;  %v2674_v28 = vld [vmem:[#allocation2 + $0x10] sm:$0xff]  ;;  %v1460_v54 = vsel %vm293_vm0, %v1191_v35, 0.0 }
  0xc2   :  { %v3604_v10 = vpop.permute.xlu2 %1605  ;;  %v1827_v62 = vsub.f32 %v2674_v28, %v3176_v0  ;;  %v280_v0 = vand.u32 2147483647, %v196_v23  ;;  %v199_v23 = vsub.f32 %v3690_v60, %v3672_v25 }
  0xc3   :  { %4506 = vst [vmem:[#allocation24_spill] sm:$0xff] %v3604_v10  ;;  %v3607_v45 = vpop.permute.xlu1 %1585  ;;  %v874_v10 = vsub.f32 %v3495_v63, %v668_v32  ;;  %v3703_v63 = vld [vmem:[#allocation2 + $0x2b8] sm:$0xff] }
  0xc4   :  { %4507 = vst [vmem:[#allocation25_spill] sm:$0xff] %v3607_v45  ;;  %v3618_v45 = vld [vmem:[#allocation2 + $0x268] sm:$0xff] }
  0xc5   :  { %v192_v59 = vsub.f32 %v3618_v45, %v3590_v3  ;;  %v194_v7 = vsub.f32 %v3623_v20, %v3618_v45  ;;  %4512 = vst [vmem:[#allocation30_spill] sm:$0xff] %v3703_v63 }
  0xc7   :  { %v276_v6 = vand.u32 2147483647, %v192_v59  ;;  %v425_v59 = vsel %vm293_vm0, %v275_v26, 0.0  ;;  %v278_v26 = vand.u32 2147483647, %v194_v7  ;;  %v873_v7 = vsub.f32 %v3497_v43, %v666_v17 }
  0xc8   :  { %1677 = vrot.lane.b32.xlu2 %v3525_v56, %s2875_s19  ;;  %v426_v50 = vadd.f32 %v425_v59, %v424_v14  ;;  %v3692_v59 = vpop.permute.xlu0 %1583  ;;  %v198_v14 = vsub.f32 %v3682_v22, %v3664_v61  ;;  %v1462_v17 = vsel %vm1337_vm2, %v1190_v39, 0.0  ;;  %v3714_v39 = vld [vmem:[#allocation2 + $0x2c0] sm:$0xff] }
  0xc9   :  { %1675 = vrot.lane.b32.xlu1 %v3530_v5, %s2875_s19  ;;  %v427_v9 = vsel %vm293_vm0, %v276_v6, 0.0  ;;  %v197_v6 = vsub.f32 %v3672_v25, %v3651_v48  ;;  %4511 = vst [vmem:[#allocation29_spill] sm:$0xff] %v3692_v59  ;;  %v2677_v59 = vld [vmem:[#allocation2 + $0x28] sm:$0xff] }
  0xca   :  { %v3647_v4 = vpop.permute.xlu2 %1611  ;;  %v428_v38 = vadd.f32 %v427_v9, %v426_v50 }
  0xcb   :  { %4508 = vst [vmem:[#allocation26_spill] sm:$0xff] %v3647_v4  ;;  %v3654_v49 = vpop.permute.xlu1 %1591  ;;  %v279_v4 = vand.u32 2147483647, %v195_v55  ;;  %v2675_v55 = vld [vmem:[#allocation2 + $0x8] sm:$0xff] }
  0xcc   :  { %4509 = vst [vmem:[#allocation27_spill] sm:$0xff] %v3654_v49  ;;  %v1458_v49 = vsel %vm1337_vm2, %v1187_v13, 0.0  ;;  %v4487_v13 = vrot.slane %v3660_v47, 1  ;;  %v1826_v35 = vsub.f32 %v2675_v55, %v3321_v24  ;;  %v969_v24 = vand.u32 2147483647, %v873_v7 }
  0xcd   :  { %v1459_v46 = vadd.f32 %v1458_v49, %v1457_v21  ;;  %v429_v49 = vsel %vm293_vm0, %v277_v53, 0.0  ;;  %v431_v21 = vsel %vm293_vm0, %v278_v26, 0.0  ;;  %v281_v53 = vand.u32 2147483647, %v197_v6 }
  0xce   :  { %v1194_v32 = vsel %vm1095_vm3, %v1192_v27, %v4487_v13  ;;  %v430_v43 = vadd.f32 %v429_v49, %v428_v38  ;;  %v433_v26 = vsel %vm293_vm0, %v279_v4, 0.0  ;;  %v669_v55 = vrot.slane %v3523_v51, 7  ;;  %v3725_v49 = vld [vmem:[#allocation2 + $0x2c8] sm:$0xff] }
  0xcf   :  { %v1461_v50 = vadd.f32 %v1460_v54, %v1459_v46  ;;  %v670_v27 = vrot.slane %v3530_v5, 7  ;;  %v3718_v46 = vand.u32 2147483647, %v874_v10  ;;  %v200_v6 = vsub.f32 %v3703_v63, %v3682_v22 }
  0xd0   :  { %1683 = vrot.lane.b32.xlu2 %v3549_v11, %s2875_s19  ;;  %v432_v13 = vadd.f32 %v431_v21, %v430_v43  ;;  %v282_v54 = vand.u32 2147483647, %v198_v14  ;;  %v435_v4 = vsel %vm293_vm0, %v280_v0, 0.0  ;;  %v1923_v7 = vand.u32 2147483647, %v1827_v62 }
  0xd1   :  { %1681 = vrot.lane.b32.xlu1 %v3556_v8, %s2875_s19  ;;  %v1922_v38 = vand.u32 2147483647, %v1826_v35  ;;  %v1464_v21 = vsel %vm293_vm0, %v1194_v32, 0.0  ;;  %v201_v10 = vsub.f32 %v3714_v39, %v3690_v60  ;;  %v283_v43 = vand.u32 2147483647, %v199_v23  ;;  %v3751_v60 = vld [vmem:[#allocation2 + $0x2e0] sm:$0xff] }
  0xd2   :  { %v3705_v9 = vpop.permute.xlu2 %1617  ;;  %v1463_v36 = vadd.f32 %v1462_v17, %v1461_v50  ;;  %v1195_v14 = vrot.slane %v969_v24, 1  ;;  %v671_v0 = vsel %vm566_vm1, %v669_v55, %v670_v27  ;;  %v284_v35 = vand.u32 2147483647, %v200_v6  ;;  %v3741_v50 = vld [vmem:[#allocation2 + $0x2d8] sm:$0xff]  ;;  %v3743_v24 = vpop.permute.xlu0 %1589 }
  0xd3   :  { %4513 = vst [vmem:[#allocation31_spill] sm:$0xff] %v3705_v9  ;;  %v3710_v28 = vpop.permute.xlu1 %1597  ;;  %v437_v9 = vsel %vm293_vm0, %v281_v53, 0.0  ;;  %v439_v32 = vsel %vm293_vm0, %v282_v54, 0.0  ;;  %v673_v23 = vrot.slane %v3567_v1, 7  ;;  %v875_v17 = vsub.f32 %v3523_v51, %v669_v55  ;;  %v2676_v54 = vld [vmem:[#allocation2 + $0x20] sm:$0xff] }
  0xd4   :  { %4514 = vst [vmem:[#allocation32_spill] sm:$0xff] %v3710_v28  ;;  %v434_v28 = vadd.f32 %v433_v26, %v432_v13  ;;  %v202_v13 = vsub.f32 %v3725_v49, %v3703_v63  ;;  %v672_v26 = vrot.slane %v3525_v56, 7  ;;  %v203_v27 = vsub.f32 %v3732_v52, %v3714_v39 }
  0xd5   :  { %v441_v6 = vsel %vm293_vm0, %v283_v43, 0.0  ;;  %v1829_v62 = vsub.f32 %v2676_v54, %v3481_v19  ;;  %v1830_v63 = vsub.f32 %v2677_v59, %v3357_v44  ;;  %v1465_v55 = vadd.f32 %v1464_v21, %v1463_v36 }
  0xd6   :  { %v436_v2 = vadd.f32 %v435_v4, %v434_v28  ;;  %v876_v28 = vsub.f32 %v3530_v5, %v671_v0  ;;  %v285_v4 = vand.u32 2147483647, %v201_v10  ;;  %v4516_v5 = vrot.slane %v3660_v47, 1  ;;  %v3769_v47 = vld [vmem:[#allocation2 + $0x2e8] sm:$0xff] }
  0xd7   :  { %v204_v43 = vsub.f32 %v3741_v50, %v3725_v49  ;;  %v286_v19 = vand.u32 2147483647, %v202_v13  ;;  %v443_v0 = vsel %vm293_vm0, %v284_v35, 0.0  ;;  %v4518_v36 = vrot.slane %v3718_v46, 1 }
  0xd8   :  { %1689 = vrot.lane.b32.xlu2 %v3584_v15, %s2875_s19  ;;  %v438_v53 = vadd.f32 %v437_v9, %v436_v2  ;;  %v1466_v10 = vsel %vm1337_vm2, %v4516_v5, 0.0  ;;  %v971_v21 = vand.u32 2147483647, %v875_v17  ;;  %v205_v13 = vsub.f32 %v3751_v60, %v3732_v52 }
  0xd9   :  { %1687 = vrot.lane.b32.xlu1 %v3590_v3, %s2875_s19  ;;  %v1197_v59 = vsel %vm1095_vm3, %v1195_v14, %v4518_v36  ;;  %v287_v35 = vand.u32 2147483647, %v203_v27  ;;  %v445_v54 = vsel %vm293_vm0, %v285_v4, 0.0  ;;  %v1925_v5 = vand.u32 2147483647, %v1829_v62  ;;  %v3784_v4 = vld [vmem:[#allocation2 + $0x2f8] sm:$0xff] }
  0xda   :  { %v440_v2 = vadd.f32 %v439_v32, %v438_v53  ;;  %v3753_v9 = vpop.permute.xlu2 %1623  ;;  %v3771_v53 = vand.u32 2147483647, %v876_v28  ;;  %v206_v17 = vsub.f32 %v3769_v47, %v3741_v50  ;;  %v447_v28 = vsel %vm293_vm0, %v286_v19, 0.0  ;;  %4519 = vst [vmem:[#allocation35_spill] sm:$0xff] %v3784_v4 }
  0xdb   :  { %4515 = vst [vmem:[#allocation33_spill] sm:$0xff] %v3753_v9  ;;  %v3762_v44 = vpop.permute.xlu1 %1603  ;;  %v3776_v9 = vld [vmem:[#allocation2 + $0x2f0] sm:$0xff]  ;;  %v1198_v36 = vrot.slane %v971_v21, 1  ;;  %v675_v19 = vrot.slane %v3556_v8, 7 }
  0xdc   :  { %4517 = vst [vmem:[#allocation34_spill] sm:$0xff] %v3762_v44  ;;  %v442_v32 = vadd.f32 %v441_v6, %v440_v2  ;;  %v1467_v44 = vadd.f32 %v1466_v10, %v1465_v55  ;;  %v288_v6 = vand.u32 2147483647, %v204_v43  ;;  %v877_v2 = vsub.f32 %v3525_v56, %v672_v26 }
  0xdd   :  { %v1199_v62 = vrot.slane %v3771_v53, 1  ;;  %v207_v55 = vsub.f32 %v3776_v9, %v3751_v60  ;;  %v289_v10 = vand.u32 2147483647, %v205_v13  ;;  %v676_v56 = vrot.slane %v3549_v11, 7 }
  0xde   :  { %v444_v14 = vadd.f32 %v443_v0, %v442_v32  ;;  %v449_v0 = vsel %vm293_vm0, %v287_v35, 0.0  ;;  %v208_v32 = vsub.f32 %v3784_v4, %v3769_v47  ;;  %v290_v53 = vand.u32 2147483647, %v206_v17  ;;  %v2679_v35 = vld [vmem:[#allocation2 + $0x38] sm:$0xff] }
  0xdf   :  { %v451_v13 = vsel %vm293_vm0, %v288_v6, 0.0  ;;  %v453_v17 = vsel %vm293_vm0, %v289_v10, 0.0 }
  0xe0   :  { %1695 = vrot.lane.b32.xlu2 %v3623_v20, %s2875_s19 }
  0xe1   :  { %1693 = vrot.lane.b32.xlu1 %v3629_v33, %s2875_s19 }
  0xe3   :  { %v3808_v6 = vpop.permute.xlu1 %1609 }
  0xe8   :  { %1701 = vrot.lane.b32.xlu2 %v3651_v48, %s2875_s19 }
  0xe9   :  { %1699 = vrot.lane.b32.xlu1 %v3662_v29, %s2875_s19 }
  0xf0   :  { %1707 = vrot.lane.b32.xlu2 %v3682_v22, %s2875_s19 }
  0xf1   :  { %1705 = vrot.lane.b32.xlu1 %v3672_v25, %s2875_s19 }
  0xf8   :  { %2117 = vrot.lane.b32.xlu2 %v1923_v7, %s2876_s0  ;;  %v674_v7 = vsel %vm566_vm1, %v672_v26, %v673_v23  ;;  %v1468_v23 = vsel %vm293_vm0, %v1197_v59, 0.0  ;;  %v2678_v59 = vld [vmem:[#allocation2 + $0x40] sm:$0xff] }
  0xf9   :  { %2115 = vrot.lane.b32.xlu1 %v1922_v38, %s2876_s0  ;;  %v1926_v38 = vand.u32 2147483647, %v1830_v63  ;;  %v878_v27 = vsub.f32 %v3567_v1, %v674_v7  ;;  %v446_v63 = vadd.f32 %v445_v54, %v444_v14  ;;  %v1833_v43 = vsub.f32 %v2678_v59, %v3278_v42  ;;  %v3794_v7 = vpop.permute.xlu0 %1595 }
  0xfa   :  { %v1469_v21 = vadd.f32 %v1468_v23, %v1467_v44  ;;  %v1832_v42 = vsub.f32 %v2679_v35, %v3389_v41  ;;  %v4520_v54 = vrot.slane %v3718_v46, 1  ;;  %v1200_v23 = vsel %vm1095_vm3, %v1198_v36, %v1199_v62 }
  0xfb   :  { %v448_v26 = vadd.f32 %v447_v28, %v446_v63  ;;  %v973_v28 = vand.u32 2147483647, %v877_v2  ;;  %v3804_v63 = vpop.permute.xlu2 %1629  ;;  %v974_v44 = vand.u32 2147483647, %v878_v27  ;;  %v291_v59 = vand.u32 2147483647, %v207_v55 }
  0xfc   :  { %v1470_v14 = vsel %vm1337_vm2, %v4520_v54, 0.0  ;;  %4521 = vst [vmem:[#allocation36_spill] sm:$0xff] %v3804_v63  ;;  %v1929_v41 = vand.u32 2147483647, %v1833_v43  ;;  %v292_v46 = vand.u32 2147483647, %v208_v32  ;;  %v879_v36 = vsub.f32 %v3556_v8, %v675_v19 }
  0xfd   :  { %v1471_v35 = vadd.f32 %v1470_v14, %v1469_v21  ;;  %v455_v54 = vsel %vm293_vm0, %v290_v53, 0.0  ;;  %v1928_v2 = vand.u32 2147483647, %v1832_v42  ;;  %v1202_v63 = vrot.slane %v974_v44, 1  ;;  %v2681_v8 = vld [vmem:[#allocation2 + $0x50] sm:$0xff] }
  0xfe   :  { %v457_v10 = vsel %vm293_vm0, %v291_v59, 0.0  ;;  %v679_v43 = vrot.slane %v3590_v3, 7  ;;  %v459_v53 = vsel %vm293_vm0, %v292_v46, 0.0  ;;  %v975_v44 = vand.u32 2147483647, %v879_v36  ;;  %v3829_v59 = vpop.permute.xlu1 %1615  ;;  %v2682_v36 = vld [vmem:[#allocation2 + $0x70] sm:$0xff] }
 0x100   :  { %2123 = vrot.lane.b32.xlu2 %v1926_v38, %s2876_s0  ;;  %v450_v38 = vadd.f32 %v449_v0, %v448_v26  ;;  %v1201_v0 = vrot.slane %v973_v28, 1  ;;  %v1472_v26 = vsel %vm293_vm0, %v1200_v23, 0.0 }
 0x101   :  { %2121 = vrot.lane.b32.xlu1 %v1925_v5, %s2876_s0  ;;  %v677_v5 = vsel %vm566_vm1, %v675_v19, %v676_v56  ;;  %v678_v56 = vrot.slane %v3582_v57, 7  ;;  %v1473_v32 = vadd.f32 %v1472_v26, %v1471_v35  ;;  %v1474_v19 = vsel %vm1337_vm2, %v1199_v62, 0.0  ;;  %v3826_v28 = vpop.permute.xlu0 %1601 }
 0x102   :  { %v452_v4 = vadd.f32 %v451_v13, %v450_v38  ;;  %v880_v55 = vsub.f32 %v3549_v11, %v677_v5  ;;  %v1835_v11 = vsub.f32 %v2681_v8, %v3316_v16  ;;  %v1203_v38 = vsel %vm1095_vm3, %v1201_v0, %v1202_v63 }
 0x103   :  { %v3824_v14 = vpop.permute.xlu2 %1635  ;;  %v1476_v16 = vsel %vm293_vm0, %v1203_v38, 0.0  ;;  %v881_v62 = vsub.f32 %v3582_v57, %v678_v56  ;;  %v681_v0 = vrot.slane %v3584_v15, 7  ;;  %v682_v26 = vrot.slane %v3618_v45, 7 }
 0x104   :  { %v454_v27 = vadd.f32 %v453_v17, %v452_v4  ;;  %v2680_v4 = vld [vmem:[#allocation2 + $0x58] sm:$0xff]  ;;  %v976_v23 = vand.u32 2147483647, %v880_v55  ;;  %v680_v17 = vsel %vm566_vm1, %v678_v56, %v679_v43  ;;  %v1931_v35 = vand.u32 2147483647, %v1835_v11  ;;  %v2683_v56 = vld [vmem:[#allocation2 + $0x68] sm:$0xff] }
 0x105   :  { %v1836_v13 = vsub.f32 %v2680_v4, %v3513_v31  ;;  %v1475_v31 = vadd.f32 %v1474_v19, %v1473_v32  ;;  %v882_v46 = vsub.f32 %v3590_v3, %v680_v17  ;;  %v1839_v55 = vsub.f32 %v2682_v36, %v3547_v30 }
 0x106   :  { %v456_v21 = vadd.f32 %v455_v54, %v454_v27  ;;  %v1204_v54 = vrot.slane %v975_v44, 1  ;;  %v1838_v3 = vsub.f32 %v2683_v56, %v3354_v58  ;;  %v3845_v4 = vpop.permute.xlu1 %1621  ;;  %v683_v8 = vsel %vm566_vm1, %v681_v0, %v682_v26 }
 0x107   :  { %v1477_v27 = vadd.f32 %v1476_v16, %v1475_v31  ;;  %v978_v32 = vand.u32 2147483647, %v882_v46  ;;  %v1935_v19 = vand.u32 2147483647, %v1839_v55  ;;  %v883_v44 = vsub.f32 %v3584_v15, %v681_v0  ;;  %v2684_v31 = vld [vmem:[#allocation2 + $0x88] sm:$0xff] }
 0x108   :  { %2129 = vrot.lane.b32.xlu2 %v1929_v41, %s2876_s0  ;;  %v458_v42 = vadd.f32 %v457_v10, %v456_v21  ;;  %v1932_v41 = vand.u32 2147483647, %v1836_v13  ;;  %v1478_v10 = vsel %vm1337_vm2, %v1202_v63, 0.0  ;;  %v977_v21 = vand.u32 2147483647, %v881_v62 }
 0x109   :  { %2127 = vrot.lane.b32.xlu1 %v1928_v2, %s2876_s0  ;;  %v1205_v2 = vrot.slane %v976_v23, 1  ;;  %v3847_v13 = vpop.permute.xlu0 %1607  ;;  %v1479_v11 = vadd.f32 %v1478_v10, %v1477_v27  ;;  %v1934_v63 = vand.u32 2147483647, %v1838_v3  ;;  %v1208_v38 = vrot.slane %v978_v32, 1 }
 0x10a   :  { %v460_v5 = vadd.f32 %v459_v53, %v458_v42  ;;  %v1207_v42 = vrot.slane %v977_v21, 1  ;;  %v884_v58 = vsub.f32 %v3618_v45, %v683_v8  ;;  %v684_v23 = vrot.slane %v3629_v33, 7 }
 0x10b   :  { %v3841_v43 = vpop.permute.xlu2 %1641  ;;  %v1206_v53 = vsel %vm1095_vm3, %v1204_v54, %v1205_v2  ;;  %v685_v17 = vrot.slane %v3623_v20, 7  ;;  %v1482_v62 = vsel %vm1337_vm2, %v1205_v2, 0.0  ;;  %v687_v0 = vrot.slane %v3649_v40, 7 }
 0x10c   :  { %461 = vadd.xlane.f32.xlu0 %v460_v5  ;;  %v1480_v30 = vsel %vm293_vm0, %v1206_v53, 0.0  ;;  %v1209_v15 = vsel %vm1095_vm3, %v1207_v42, %v1208_v38  ;;  %v688_v26 = vrot.slane %v3662_v29, 7  ;;  %v979_v27 = vand.u32 2147483647, %v883_v44 }
 0x10d   :  { %v1481_v5 = vadd.f32 %v1480_v30, %v1479_v11  ;;  %v3867_v36 = vand.u32 2147483647, %v884_v58  ;;  %v1484_v2 = vsel %vm293_vm0, %v1209_v15, 0.0  ;;  %v885_v56 = vsub.f32 %v3629_v33, %v684_v23  ;;  %v2686_v11 = vld [vmem:[#allocation2 + $0xa0] sm:$0xff]  ;;  %v2687_v30 = vld [vmem:[#allocation2 + $0x98] sm:$0xff] }
 0x10e   :  { %v3863_v54 = vpop.permute.xlu1 %1627  ;;  %v689_v21 = vsel %vm566_vm1, %v687_v0, %v688_v26  ;;  %v690_v32 = vrot.slane %v3651_v48, 7  ;;  %v691_v53 = vrot.slane %v3664_v61, 7  ;;  %v1210_v42 = vrot.slane %v979_v27, 1  ;;  %v4522_v15 = vld [vmem:[#allocation28_spill] sm:$0xff]  ;;  %v4523_v27 = vld [vmem:[#allocation30_spill] sm:$0xff] }
 0x10f   :  { %v1483_v55 = vadd.f32 %v1482_v62, %v1481_v5  ;;  %v1211_v44 = vrot.slane %v3867_v36, 1  ;;  %v1486_v33 = vsel %vm1337_vm2, %v1208_v38, 0.0  ;;  %v696_v26 = vrot.slane %v4522_v15, 7 }
 0x110   :  { %2135 = vrot.lane.b32.xlu2 %v1932_v41, %s2876_s0  ;;  %v1842_v41 = vsub.f32 %v2684_v31, %v3594_v37  ;;  %v686_v37 = vsel %vm566_vm1, %v684_v23, %v685_v17  ;;  %v887_v23 = vsub.f32 %v3649_v40, %v687_v0  ;;  %v692_v5 = vsel %vm566_vm1, %v690_v32, %v691_v53 }
 0x111   :  { %2133 = vrot.lane.b32.xlu1 %v1931_v35, %s2876_s0  ;;  %v2685_v35 = vld [vmem:[#allocation2 + $0x80] sm:$0xff]  ;;  %v3872_v3 = vpop.permute.xlu0 %1613  ;;  %v886_v8 = vsub.f32 %v3623_v20, %v686_v37  ;;  %v1485_v58 = vadd.f32 %v1484_v2, %v1483_v55  ;;  %v693_v20 = vrot.slane %v3672_v25, 7  ;;  %v981_v31 = vand.u32 2147483647, %v885_v56  ;;  %v4524_v2 = vld [vmem:[#allocation29_spill] sm:$0xff] }
 0x112   :  { %v1841_v16 = vsub.f32 %v2685_v35, %v3384_v34  ;;  %v1938_v10 = vand.u32 2147483647, %v1842_v41  ;;  %v697_v36 = vrot.slane %v4523_v27, 7  ;;  %v889_v0 = vsub.f32 %v3651_v48, %v690_v32 }
 0x113   :  { %v3861_v46 = vpop.permute.xlu2 %1647  ;;  %v982_v38 = vand.u32 2147483647, %v886_v8  ;;  %v1487_v62 = vadd.f32 %v1486_v33, %v1485_v58  ;;  %v890_v37 = vsub.f32 %v3664_v61, %v692_v5  ;;  %v983_v55 = vand.u32 2147483647, %v887_v23  ;;  %v2689_v5 = vld [vmem:[#allocation2 + $0xb0] sm:$0xff] }
 0x114   :  { %v1937_v34 = vand.u32 2147483647, %v1841_v16  ;;  %v1212_v16 = vsel %vm1095_vm3, %v1210_v42, %v1211_v44  ;;  %v1213_v53 = vrot.slane %v981_v31, 1  ;;  %v698_v32 = vsel %vm566_vm1, %v696_v26, %v697_v36  ;;  %v4525_v31 = vld [vmem:[#allocation16_spill] sm:$0xff] }
 0x115   :  { %v1214_v8 = vrot.slane %v982_v38, 1  ;;  %v985_v42 = vand.u32 2147483647, %v889_v0  ;;  %v3916_v58 = vand.u32 2147483647, %v890_v37  ;;  %v1847_v38 = vsub.f32 %v2689_v5, %v4525_v31  ;;  %v4526_v31 = vld [vmem:[#allocation18_spill] sm:$0xff] }
 0x116   :  { %v3890_v17 = vpop.permute.xlu1 %1633 }
 0x117   :  { %v1219_v0 = vrot.slane %v985_v42, 1 }
 0x118   :  { %2141 = vrot.lane.b32.xlu2 %v1935_v19, %s2876_s0  ;;  %v1845_v19 = vsub.f32 %v2686_v11, %v3640_v12  ;;  %v694_v12 = vrot.slane %v3682_v22, 7  ;;  %v699_v11 = vrot.slane %v3714_v39, 7 }
 0x119   :  { %2139 = vrot.lane.b32.xlu1 %v1934_v63, %s2876_s0  ;;  %v1844_v63 = vsub.f32 %v2687_v30, %v3420_v18  ;;  %v888_v18 = vsub.f32 %v3662_v29, %v689_v21  ;;  %v1488_v21 = vsel %vm293_vm0, %v1212_v16, 0.0  ;;  %v3908_v48 = vpop.permute.xlu0 %1619  ;;  %v891_v30 = vsub.f32 %v3672_v25, %v693_v20 }
 0x11a   :  { %v1941_v41 = vand.u32 2147483647, %v1845_v19  ;;  %v695_v29 = vsel %vm566_vm1, %v693_v20, %v694_v12  ;;  %v700_v19 = vrot.slane %v3725_v49, 7  ;;  %v1489_v33 = vadd.f32 %v1488_v21, %v1487_v62 }
 0x11b   :  { %v1940_v35 = vand.u32 2147483647, %v1844_v63  ;;  %v892_v63 = vsub.f32 %v3682_v22, %v695_v29  ;;  %v1216_v12 = vrot.slane %v983_v55, 1  ;;  %v702_v25 = vrot.slane %v3732_v52, 7 }
 0x11c   :  { %v1215_v22 = vsel %vm1095_vm3, %v1213_v53, %v1214_v8  ;;  %v701_v20 = vsel %vm566_vm1, %v699_v11, %v700_v19  ;;  %v894_v16 = vsub.f32 %v4523_v27, %v698_v32  ;;  %v987_v62 = vand.u32 2147483647, %v891_v30 }
 0x11d   :  { %v3928_v36 = vand.u32 2147483647, %v892_v63  ;;  %v1490_v29 = vsel %vm1337_vm2, %v1211_v44, 0.0  ;;  %v1220_v55 = vrot.slane %v3916_v58, 1  ;;  %v705_v53 = vrot.slane %v3751_v60, 7 }
 0x11e   :  { %v1494_v19 = vsel %vm1337_vm2, %v1214_v8, 0.0  ;;  %v706_v44 = vrot.slane %v3769_v47, 7  ;;  %v895_v30 = vsub.f32 %v3714_v39, %v699_v11  ;;  %v896_v42 = vsub.f32 %v3725_v49, %v701_v20  ;;  %v2691_v11 = vld [vmem:[#allocation2 + $0xc8] sm:$0xff] }
 0x11f   :  { %v990_v58 = vand.u32 2147483647, %v894_v16  ;;  %v1221_v8 = vsel %vm1095_vm3, %v1219_v0, %v1220_v55  ;;  %v1223_v5 = vrot.slane %v3928_v36, 1 }
 0x120   :  { %2147 = vrot.lane.b32.xlu2 %v1938_v10, %s2876_s0  ;;  %1673 = vrot.lane.b32.xlu0 %v3523_v51, %s2875_s19  ;;  %v3894_v51 = vpop.permute.xlu2 %1653  ;;  %v3901_v10 = vand.u32 2147483647, %v888_v18  ;;  %v991_v0 = vand.u32 2147483647, %v895_v30  ;;  %v992_v36 = vand.u32 2147483647, %v896_v42 }
 0x121   :  { %2145 = vrot.lane.b32.xlu1 %v1937_v34, %s2876_s0  ;;  %v2688_v34 = vld [vmem:[#allocation2 + $0xb8] sm:$0xff] }
 0x122   :  { %v1848_v56 = vsub.f32 %v2688_v34, %v4524_v2  ;;  %v1217_v23 = vrot.slane %v3901_v10, 1  ;;  %v1491_v10 = vadd.f32 %v1490_v29, %v1489_v33  ;;  %v1492_v34 = vsel %vm293_vm0, %v1215_v22, 0.0 }
 0x123   :  { %v1943_v2 = vand.u32 2147483647, %v1847_v38  ;;  %v3951_v38 = vpop.permute.xlu0 %1625  ;;  %v1500_v29 = vsel %vm293_vm0, %v1221_v8, 0.0  ;;  %v1229_v8 = vrot.slane %v992_v36, 1 }
 0x124   :  { %v1944_v18 = vand.u32 2147483647, %v1848_v56  ;;  %v1218_v37 = vsel %vm1095_vm3, %v1216_v12, %v1217_v23  ;;  %v2690_v56 = vld [vmem:[#allocation2 + $0xd0] sm:$0xff]  ;;  %v1493_v63 = vadd.f32 %v1492_v34, %v1491_v10  ;;  %v1222_v12 = vrot.slane %v987_v62, 1 }
 0x125   :  { %v1851_v21 = vsub.f32 %v2690_v56, %v3743_v24  ;;  %v1496_v24 = vsel %vm293_vm0, %v1218_v37, 0.0  ;;  %v1498_v20 = vsel %vm1337_vm2, %v1217_v23, 0.0  ;;  %v1226_v34 = vrot.slane %v990_v58, 1 }
 0x126   :  { %v1495_v39 = vadd.f32 %v1494_v19, %v1493_v63  ;;  %v1224_v37 = vsel %vm1095_vm3, %v1222_v12, %v1223_v5  ;;  %v2692_v19 = vld [vmem:[#allocation2 + $0xe8] sm:$0xff] }
 0x127   :  { %v1854_v23 = vsub.f32 %v2692_v19, %v3794_v7  ;;  %v2694_v19 = vld [vmem:[#allocation2 + $0x100] sm:$0xff] }
 0x128   :  { %2153 = vrot.lane.b32.xlu2 %v1941_v41, %s2876_s0  ;;  %1679 = vrot.lane.b32.xlu0 %v3567_v1, %s2875_s19  ;;  %v3920_v41 = vpop.permute.xlu1 %1639  ;;  %v893_v1 = vsub.f32 %v4522_v15, %v696_v26  ;;  %v3935_v26 = vpop.permute.xlu2 %1659  ;;  %v1497_v16 = vadd.f32 %v1496_v24, %v1495_v39  ;;  %v1504_v24 = vsel %vm293_vm0, %v1224_v37, 0.0  ;;  %v2693_v39 = vld [vmem:[#allocation2 + $0xe0] sm:$0xff] }
 0x129   :  { %2151 = vrot.lane.b32.xlu1 %v1940_v35, %s2876_s0  ;;  %v703_v35 = vrot.slane %v3741_v50, 7 }
 0x12a   :  { %v989_v33 = vand.u32 2147483647, %v893_v1  ;;  %v707_v1 = vsel %vm566_vm1, %v705_v53, %v706_v44  ;;  %v4527_v44 = vld [vmem:[#allocation35_spill] sm:$0xff] }
 0x12b   :  { %v704_v32 = vsel %vm566_vm1, %v702_v25, %v703_v35  ;;  %v1947_v35 = vand.u32 2147483647, %v1851_v21  ;;  %v1502_v21 = vsel %vm1337_vm2, %v1220_v55, 0.0  ;;  %v709_v63 = vrot.slane %v4527_v44, 7 }
 0x12c   :  { %v898_v62 = vsub.f32 %v3741_v50, %v704_v32  ;;  %v1225_v10 = vrot.slane %v989_v33, 1  ;;  %v899_v50 = vsub.f32 %v3751_v60, %v705_v53  ;;  %v900_v42 = vsub.f32 %v3769_v47, %v707_v1  ;;  %v4528_v53 = vld [vmem:[#allocation20_spill] sm:$0xff]  ;;  %v3977_v1 = vpop.permute.xlu0 %1631 }
 0x12d   :  { %v1228_v55 = vrot.slane %v991_v0, 1 }
 0x12e   :  { %v994_v58 = vand.u32 2147483647, %v898_v62  ;;  %v1227_v7 = vsel %vm1095_vm3, %v1225_v10, %v1226_v34  ;;  %v996_v62 = vand.u32 2147483647, %v900_v42 }
 0x12f   :  { %v1230_v0 = vsel %vm1095_vm3, %v1228_v55, %v1229_v8  ;;  %v1514_v55 = vsel %vm1337_vm2, %v1229_v8, 0.0 }
 0x130   :  { %2159 = vrot.lane.b32.xlu2 %v1944_v18, %s2876_s0  ;;  %1685 = vrot.lane.b32.xlu0 %v3582_v57, %s2875_s19  ;;  %v1850_v18 = vsub.f32 %v2691_v11, %v4526_v31  ;;  %v3953_v22 = vpop.permute.xlu1 %1645  ;;  %v897_v57 = vsub.f32 %v3732_v52, %v702_v25  ;;  %v708_v25 = vrot.slane %v3776_v9, 7  ;;  %v3967_v30 = vpop.permute.xlu2 %1665  ;;  %v1853_v11 = vsub.f32 %v2693_v39, %v4528_v53 }
 0x131   :  { %2157 = vrot.lane.b32.xlu1 %v1943_v2, %s2876_s0  ;;  %v1499_v2 = vadd.f32 %v1498_v20, %v1497_v16  ;;  %v1506_v31 = vsel %vm1337_vm2, %v1223_v5, 0.0  ;;  %v995_v16 = vand.u32 2147483647, %v899_v50  ;;  %v1232_v37 = vrot.slane %v994_v58, 1 }
 0x132   :  { %v1946_v56 = vand.u32 2147483647, %v1850_v18  ;;  %v993_v33 = vand.u32 2147483647, %v897_v57  ;;  %v1950_v18 = vand.u32 2147483647, %v1854_v23  ;;  %v710_v57 = vsel %vm566_vm1, %v708_v25, %v709_v63 }
 0x133   :  { %v1501_v32 = vadd.f32 %v1500_v29, %v1499_v2  ;;  %v1508_v29 = vsel %vm293_vm0, %v1227_v7, 0.0  ;;  %v1949_v2 = vand.u32 2147483647, %v1853_v11  ;;  %v1510_v5 = vsel %vm1337_vm2, %v1226_v34, 0.0  ;;  %v2695_v34 = vld [vmem:[#allocation2 + $0xf8] sm:$0xff] }
 0x134   :  { %v1231_v36 = vrot.slane %v993_v33, 1  ;;  %v1857_v23 = vsub.f32 %v2694_v19, %v3826_v28  ;;  %v902_v63 = vsub.f32 %v4527_v44, %v710_v57  ;;  %v1512_v50 = vsel %vm293_vm0, %v1230_v0, 0.0  ;;  %v3998_v57 = vpop.permute.xlu0 %1637 }
 0x135   :  { %v1503_v12 = vadd.f32 %v1502_v21, %v1501_v32  ;;  %v901_v21 = vsub.f32 %v3776_v9, %v708_v25  ;;  %v1234_v42 = vrot.slane %v995_v16, 1  ;;  %v1235_v33 = vrot.slane %v996_v62, 1 }
 0x136   :  { %v1233_v32 = vsel %vm1095_vm3, %v1231_v36, %v1232_v37  ;;  %v1953_v25 = vand.u32 2147483647, %v1857_v23  ;;  %v998_v11 = vand.u32 2147483647, %v902_v63  ;;  %v1518_v16 = vsel %vm1337_vm2, %v1232_v37, 0.0 }
 0x137   :  { %v1505_v20 = vadd.f32 %v1504_v24, %v1503_v12  ;;  %v4529_v24 = vld [vmem:[#allocation22_spill] sm:$0xff]  ;;  %v1516_v39 = vsel %vm293_vm0, %v1233_v32, 0.0  ;;  %v997_v53 = vand.u32 2147483647, %v901_v21  ;;  %v1522_v37 = vsel %vm1337_vm2, %v1235_v33, 0.0 }
 0x138   :  { %2165 = vrot.lane.b32.xlu2 %v1947_v35, %s2876_s0  ;;  %v3975_v35 = vpop.permute.xlu1 %1651  ;;  %v1856_v7 = vsub.f32 %v2695_v34, %v4529_v24  ;;  %v3992_v12 = vpop.permute.xlu2 %1671  ;;  %v2698_v24 = vld [vmem:[#allocation2 + $0x130] sm:$0xff] }
 0x139   :  { %2163 = vrot.lane.b32.xlu1 %v1946_v56, %s2876_s0  ;;  %v1507_v10 = vadd.f32 %v1506_v31, %v1505_v20  ;;  %v1236_v31 = vsel %vm1095_vm3, %v1234_v42, %v1235_v33  ;;  %v1237_v36 = vrot.slane %v997_v53, 1  ;;  %v4531_v33 = vld [vmem:[#allocation26_spill] sm:$0xff] }
 0x13a   :  { %v1952_v20 = vand.u32 2147483647, %v1856_v7  ;;  %v1520_v8 = vsel %vm293_vm0, %v1236_v31, 0.0  ;;  %v1863_v7 = vsub.f32 %v2698_v24, %v3872_v3 }
 0x13b   :  { %v1509_v56 = vadd.f32 %v1508_v29, %v1507_v10  ;;  %v2696_v29 = vld [vmem:[#allocation2 + $0x118] sm:$0xff]  ;;  %v1238_v10 = vrot.slane %v998_v11, 1 }
 0x13c   :  { %v1860_v0 = vsub.f32 %v2696_v29, %v3847_v13  ;;  %v4013_v13 = vpop.permute.xlu0 %1643  ;;  %v1959_v11 = vand.u32 2147483647, %v1863_v7  ;;  %v2705_v7 = vld [vmem:[#allocation2 + $0x170] sm:$0xff] }
 0x13d   :  { %v1511_v58 = vadd.f32 %v1510_v5, %v1509_v56  ;;  %v2697_v5 = vld [vmem:[#allocation2 + $0x110] sm:$0xff]  ;;  %v4530_v56 = vld [vmem:[#allocation24_spill] sm:$0xff]  ;;  %v1239_v32 = vsel %vm1095_vm3, %v1237_v36, %v1238_v10  ;;  %v1526_v53 = vsel %vm1337_vm2, %v1238_v10, 0.0 }
 0x13e   :  { %v1859_v19 = vsub.f32 %v2697_v5, %v4530_v56  ;;  %v1524_v34 = vsel %vm293_vm0, %v1239_v32, 0.0  ;;  %v2702_v56 = vld [vmem:[#allocation2 + $0x160] sm:$0xff] }
 0x13f   :  { %v1513_v28 = vadd.f32 %v1512_v50, %v1511_v58  ;;  %v1956_v50 = vand.u32 2147483647, %v1860_v0 }
 0x140   :  { %2171 = vrot.lane.b32.xlu2 %v1950_v18, %s2876_s0  ;;  %v3994_v9 = vpop.permute.xlu1 %1657  ;;  %v4009_v63 = vpop.permute.xlu2 %1677  ;;  %v1955_v42 = vand.u32 2147483647, %v1859_v19  ;;  %v1869_v19 = vsub.f32 %v2702_v56, %v3951_v38 }
 0x141   :  { %2169 = vrot.lane.b32.xlu1 %v1949_v2, %s2876_s0  ;;  %v1515_v18 = vadd.f32 %v1514_v55, %v1513_v28  ;;  %v2699_v55 = vld [vmem:[#allocation2 + $0x128] sm:$0xff] }
 0x142   :  { %v1862_v28 = vsub.f32 %v2699_v55, %v4531_v33  ;;  %v1965_v32 = vand.u32 2147483647, %v1869_v19  ;;  %v4534_v55 = vld [vmem:[#allocation36_spill] sm:$0xff] }
 0x143   :  { %v1517_v62 = vadd.f32 %v1516_v39, %v1515_v18  ;;  %v1871_v33 = vsub.f32 %v2705_v7, %v4534_v55 }
 0x144   :  { %v1958_v31 = vand.u32 2147483647, %v1862_v28  ;;  %v4028_v0 = vpop.permute.xlu0 %1649 }
 0x145   :  { %v1519_v2 = vadd.f32 %v1518_v16, %v1517_v62  ;;  %v2700_v16 = vld [vmem:[#allocation2 + $0x148] sm:$0xff]  ;;  %v2701_v62 = vld [vmem:[#allocation2 + $0x140] sm:$0xff] }
 0x146   :  { %v1866_v3 = vsub.f32 %v2700_v16, %v3908_v48  ;;  %v2703_v48 = vld [vmem:[#allocation2 + $0x158] sm:$0xff] }
 0x147   :  { %v1521_v23 = vadd.f32 %v1520_v8, %v1519_v2  ;;  %v4532_v8 = vld [vmem:[#allocation31_spill] sm:$0xff] }
 0x148   :  { %2177 = vrot.lane.b32.xlu2 %v1953_v25, %s2876_s0  ;;  %v4006_v21 = vpop.permute.xlu1 %1663  ;;  %v4022_v18 = vpop.permute.xlu2 %1683  ;;  %v1865_v29 = vsub.f32 %v2701_v62, %v4532_v8  ;;  %v1962_v10 = vand.u32 2147483647, %v1866_v3 }
 0x149   :  { %2175 = vrot.lane.b32.xlu1 %v1952_v20, %s2876_s0  ;;  %v1523_v58 = vadd.f32 %v1522_v37, %v1521_v23  ;;  %v4533_v23 = vld [vmem:[#allocation33_spill] sm:$0xff] }
 0x14a   :  { %v1961_v2 = vand.u32 2147483647, %v1865_v29  ;;  %v1868_v37 = vsub.f32 %v2703_v48, %v4533_v23 }
 0x14b   :  { %v1525_v25 = vadd.f32 %v1524_v34, %v1523_v58  ;;  %v2704_v34 = vld [vmem:[#allocation2 + $0x178] sm:$0xff] }
 0x14c   :  { %v1964_v58 = vand.u32 2147483647, %v1868_v37  ;;  %v1872_v24 = vsub.f32 %v2704_v34, %v3977_v1  ;;  %v2710_v37 = vld [vmem:[#allocation2] sm:$0xff] }
 0x14d   :  { %v1527_v20 = vadd.f32 %v1526_v53, %v1525_v25  ;;  %v1967_v53 = vand.u32 2147483647, %v1871_v33 }
 0x14e   :  { %v1968_v28 = vand.u32 2147483647, %v1872_v24  ;;  %v2712_v24 = vld [vmem:[#allocation2 + $0x1b8] sm:$0xff] }
 0x14f   :  { %v1880_v7 = vsub.f32 %v2712_v24, %v3861_v46  ;;  %v2714_v46 = vld [vmem:[#allocation2 + $0x1d8] sm:$0xff] }
 0x150   :  { %2183 = vrot.lane.b32.xlu2 %v1956_v50, %s2876_s0  ;;  %v4019_v39 = vpop.permute.xlu1 %1669  ;;  %v4033_v5 = vpop.permute.xlu2 %1689 }
 0x151   :  { %2181 = vrot.lane.b32.xlu1 %v1955_v42, %s2876_s0  ;;  %v4038_v50 = vpop.permute.xlu0 %1655 }
 0x158   :  { %2189 = vrot.lane.b32.xlu2 %v1959_v11, %s2876_s0  ;;  %v4030_v36 = vpop.permute.xlu1 %1675  ;;  %v4046_v38 = vpop.permute.xlu2 %1695 }
 0x159   :  { %2187 = vrot.lane.b32.xlu1 %v1958_v31, %s2876_s0  ;;  %v4050_v11 = vpop.permute.xlu0 %1661  ;;  %v2706_v31 = vld [vmem:[#allocation2 + $0x190] sm:$0xff] }
 0x15a   :  { %1528 = vadd.xlane.f32.xlu0 %v1527_v20  ;;  %v1875_v1 = vsub.f32 %v2706_v31, %v3998_v57  ;;  %v2707_v20 = vld [vmem:[#allocation2 + $0x188] sm:$0xff]  ;;  %v1976_v31 = vand.u32 2147483647, %v1880_v7 }
 0x15b   :  { %v1874_v16 = vsub.f32 %v2707_v20, %v3824_v14 }
 0x15c   :  { %v1971_v62 = vand.u32 2147483647, %v1875_v1 }
 0x15d   :  { %v1970_v29 = vand.u32 2147483647, %v1874_v16  ;;  %v4536_v16 = vld [vmem:[#allocation12_spill] sm:$0xff] }
 0x160   :  { %2195 = vrot.lane.b32.xlu2 %v1962_v10, %s2876_s0  ;;  %v4040_v42 = vpop.permute.xlu1 %1681  ;;  %v4058_v3 = vpop.permute.xlu2 %1701  ;;  %v2708_v10 = vld [vmem:[#allocation2 + $0x1a8] sm:$0xff] }
 0x161   :  { %2193 = vrot.lane.b32.xlu1 %v1961_v2, %s2876_s0  ;;  %v1878_v57 = vsub.f32 %v2708_v10, %v4013_v13  ;;  %v2709_v2 = vld [vmem:[#allocation2 + $0x1a0] sm:$0xff] }
 0x162   :  { %v1877_v14 = vsub.f32 %v2709_v2, %v3841_v43 }
 0x163   :  { %v1974_v56 = vand.u32 2147483647, %v1878_v57  ;;  %v2715_v57 = vld [vmem:[#allocation2 + $0x1d0] sm:$0xff] }
 0x164   :  { %v1973_v48 = vand.u32 2147483647, %v1877_v14  ;;  %v1883_v2 = vsub.f32 %v2715_v57, %v3894_v51  ;;  %v2718_v51 = vld [vmem:[#allocation2 + $0x1e8] sm:$0xff] }
 0x168   :  { %2201 = vrot.lane.b32.xlu2 %v1965_v32, %s2876_s0  ;;  %v4048_v25 = vpop.permute.xlu1 %1687  ;;  %v4072_v23 = vpop.permute.xlu2 %1707  ;;  %v4535_v32 = vld [vmem:[#allocation14_spill] sm:$0xff] }
 0x169   :  { %2199 = vrot.lane.b32.xlu1 %v1964_v58, %s2876_s0  ;;  %v1825_v13 = vsub.f32 %v2710_v37, %v4535_v32  ;;  %v2711_v58 = vld [vmem:[#allocation2 + $0x1c0] sm:$0xff]  ;;  %v1979_v37 = vand.u32 2147483647, %v1883_v2  ;;  %v2716_v32 = vld [vmem:[#allocation2 + $0x30] sm:$0xff] }
 0x16a   :  { %v1881_v43 = vsub.f32 %v2711_v58, %v4028_v0  ;;  %v2713_v0 = vld [vmem:[#allocation2 + $0x18] sm:$0xff]  ;;  %v2717_v58 = vld [vmem:[#allocation2 + $0x1f0] sm:$0xff] }
 0x16b   :  { %v1921_v33 = vand.u32 2147483647, %v1825_v13  ;;  %v4537_v13 = vld [vmem:[#allocation13_spill] sm:$0xff] }
 0x16c   :  { %v2722_v2 = vld [vmem:[#allocation2 + $0x210] sm:$0xff] }
 0x16e   :  { %1691 = vrot.lane.b32.xlu0 %v3618_v45, %s2875_s19  ;;  %v4065_v45 = vpop.permute.xlu0 %1667 }
 0x170   :  { %2207 = vrot.lane.b32.xlu2 %v1968_v28, %s2876_s0  ;;  %v4060_v8 = vpop.permute.xlu1 %1693  ;;  %v1977_v28 = vand.u32 2147483647, %v1881_v43  ;;  %v4085_v20 = vpop.permute.xlu2 %2117  ;;  %v1887_v43 = vsub.f32 %v2717_v58, %v4050_v11  ;;  %v2720_v11 = vld [vmem:[#allocation2 + $0x200] sm:$0xff] }
 0x171   :  { %2205 = vrot.lane.b32.xlu1 %v1967_v53, %s2876_s0 }
 0x176   :  { %1697 = vrot.lane.b32.xlu0 %v3649_v40, %s2875_s19 }
 0x178   :  { %2213 = vrot.lane.b32.xlu2 %v1971_v62, %s2876_s0  ;;  %v4070_v19 = vpop.permute.xlu1 %1699  ;;  %v1828_v62 = vsub.f32 %v2713_v0, %v4536_v16  ;;  %v4099_v24 = vpop.permute.xlu2 %2123  ;;  %v1889_v0 = vsub.f32 %v2720_v11, %v3967_v30 }
 0x179   :  { %2211 = vrot.lane.b32.xlu1 %v1970_v29, %s2876_s0  ;;  %v1884_v29 = vsub.f32 %v2714_v46, %v4038_v50  ;;  %v1831_v50 = vsub.f32 %v2716_v32, %v4537_v13  ;;  %v4540_v32 = vld [vmem:[#allocation19_spill] sm:$0xff] }
 0x17a   :  { %v1985_v46 = vand.u32 2147483647, %v1889_v0  ;;  %v4542_v0 = vld [vmem:[#allocation23_spill] sm:$0xff] }
 0x17b   :  { %v1927_v7 = vand.u32 2147483647, %v1831_v50  ;;  %v2724_v50 = vld [vmem:[#allocation2 + $0x218] sm:$0xff] }
 0x17c   :  { %v1892_v58 = vsub.f32 %v2724_v50, %v3992_v12 }
 0x17e   :  { %1703 = vrot.lane.b32.xlu0 %v3664_v61, %s2875_s19 }
 0x17f   :  { %v462_v40 = vpop.xlane.xlu0 %461 }
 0x180   :  { %2219 = vrot.lane.b32.xlu2 %v1974_v56, %s2876_s0  ;;  %v463_v34 = vrot.slane %v462_v40, 4  ;;  %v4081_v61 = vpop.permute.xlu1 %1705  ;;  %v1924_v56 = vand.u32 2147483647, %v1828_v62 }
 0x181   :  { %2217 = vrot.lane.b32.xlu1 %v1973_v48, %s2876_s0  ;;  %v1980_v48 = vand.u32 2147483647, %v1884_v29  ;;  %v2721_v29 = vld [vmem:[#allocation2 + $0x60] sm:$0xff] }
 0x182   :  { %v464_v55 = vadd.f32 %v463_v34, %v462_v40  ;;  %v1886_v34 = vsub.f32 %v2718_v51, %v3935_v26  ;;  %v4108_v26 = vpop.permute.xlu2 %2129  ;;  %v1988_v51 = vand.u32 2147483647, %v1892_v58 }
 0x184   :  { %v465_v53 = vrot.slane %v464_v55, 2 }
 0x186   :  { %2113 = vrot.lane.b32.xlu0 %v1921_v33, %s2876_s0  ;;  %v466_v1 = vadd.f32 %v465_v53, %v464_v55  ;;  %v1983_v55 = vand.u32 2147483647, %v1887_v43  ;;  %v2719_v53 = vld [vmem:[#allocation2 + $0x48] sm:$0xff] }
 0x188   :  { %2225 = vrot.lane.b32.xlu2 %v1977_v28, %s2876_s0  ;;  %v467_v10 = vrot.slane %v466_v1, 1  ;;  %v4091_v40 = vpop.permute.xlu1 %2115  ;;  %v1982_v28 = vand.u32 2147483647, %v1886_v34 }
 0x189   :  { %2223 = vrot.lane.b32.xlu1 %v1976_v31, %s2876_s0  ;;  %v4538_v31 = vld [vmem:[#allocation15_spill] sm:$0xff] }
 0x18a   :  { %v468_v14 = vadd.f32 %v467_v10, %v466_v1  ;;  %v1834_v1 = vsub.f32 %v2719_v53, %v4538_v31  ;;  %v4539_v10 = vld [vmem:[#allocation17_spill] sm:$0xff] }
 0x18b   :  { %v1837_v57 = vsub.f32 %v2721_v29, %v4539_v10 }
 0x18c   :  { %2660 = vpush %v468_v14  ;;  %v1930_v16 = vand.u32 2147483647, %v1834_v1  ;;  %v1891_v14 = vsub.f32 %v2722_v2, %v4019_v39 }
 0x18d   :  { %v1933_v30 = vand.u32 2147483647, %v1837_v57 }
 0x18e   :  { %2119 = vrot.lane.b32.xlu0 %v1924_v56, %s2876_s0  ;;  %v1987_v56 = vand.u32 2147483647, %v1891_v14 }
 0x190   :  { %2231 = vrot.lane.b32.xlu2 %v1980_v48, %s2876_s0  ;;  %v4101_v33 = vpop.permute.xlu1 %2121 }
 0x191   :  { %2229 = vrot.lane.b32.xlu1 %v1979_v37, %s2876_s0  ;;  %v4120_v37 = vpop.permute.xlu2 %2135 }
 0x192   :  { %v4138_v12 = vpop.permute.xlu0 %1673 }
 0x196   :  { %2125 = vrot.lane.b32.xlu0 %v1927_v7, %s2876_s0  ;;  %v4541_v7 = vld [vmem:[#allocation21_spill] sm:$0xff] }
 0x198   :  { %2237 = vrot.lane.b32.xlu2 %v1983_v55, %s2876_s0  ;;  %v4110_v62 = vpop.permute.xlu1 %2127 }
 0x199   :  { %2235 = vrot.lane.b32.xlu1 %v1982_v28, %s2876_s0  ;;  %v4133_v34 = vpop.permute.xlu2 %2141  ;;  %v2726_v28 = vld [vmem:[#allocation2 + $0x228] sm:$0xff] }
 0x19a   :  { %v1894_v53 = vsub.f32 %v2726_v28, %v4030_v36  ;;  %v4150_v10 = vpop.permute.xlu0 %1679 }
 0x19c   :  { %v1990_v1 = vand.u32 2147483647, %v1894_v53 }
 0x19e   :  { %2131 = vrot.lane.b32.xlu0 %v1930_v16, %s2876_s0 }
 0x1a0   :  { %1709 = vrot.lane.b32.xlu2 %v4522_v15, %s2875_s19  ;;  %v4118_v48 = vpop.permute.xlu1 %2133  ;;  %v2723_v15 = vld [vmem:[#allocation2 + $0x78] sm:$0xff] }
 0x1a1   :  { %2241 = vrot.lane.b32.xlu1 %v1985_v46, %s2876_s0  ;;  %v1840_v13 = vsub.f32 %v2723_v15, %v4540_v32  ;;  %v2728_v46 = vld [vmem:[#allocation2 + $0x230] sm:$0xff]  ;;  %v4148_v36 = vpop.permute.xlu2 %2147  ;;  %v2730_v15 = vld [vmem:[#allocation2 + $0x240] sm:$0xff] }
 0x1a2   :  { %v1895_v29 = vsub.f32 %v2728_v46, %v4009_v63  ;;  %v4543_v63 = vld [vmem:[#allocation25_spill] sm:$0xff]  ;;  %v1897_v32 = vsub.f32 %v2730_v15, %v4040_v42 }
 0x1a3   :  { %v1936_v39 = vand.u32 2147483647, %v1840_v13 }
 0x1a4   :  { %v1991_v14 = vand.u32 2147483647, %v1895_v29  ;;  %v1993_v58 = vand.u32 2147483647, %v1897_v32  ;;  %v2734_v29 = vld [vmem:[#allocation2 + $0x260] sm:$0xff] }
 0x1a6   :  { %2137 = vrot.lane.b32.xlu0 %v1933_v30, %s2876_s0 }
 0x1a8   :  { %2245 = vrot.lane.b32.xlu2 %v1987_v56, %s2876_s0  ;;  %v4128_v43 = vpop.permute.xlu1 %2139 }
 0x1a9   :  { %1711 = vrot.lane.b32.xlu1 %v4523_v27, %s2875_s19  ;;  %v2725_v27 = vld [vmem:[#allocation2 + $0x90] sm:$0xff]  ;;  %v4161_v13 = vpop.permute.xlu2 %2153 }
 0x1aa   :  { %v1843_v55 = vsub.f32 %v2725_v27, %v4541_v7  ;;  %v4544_v27 = vld [vmem:[#allocation27_spill] sm:$0xff] }
 0x1ac   :  { %v1939_v31 = vand.u32 2147483647, %v1843_v55  ;;  %v2732_v55 = vld [vmem:[#allocation2 + $0x248] sm:$0xff] }
 0x1ad   :  { %v1898_v42 = vsub.f32 %v2732_v55, %v4022_v18  ;;  %v1901_v18 = vsub.f32 %v2734_v29, %v4033_v5  ;;  %v2736_v5 = vld [vmem:[#allocation2 + $0x108] sm:$0xff] }
 0x1ae   :  { %2143 = vrot.lane.b32.xlu0 %v1936_v39, %s2876_s0 }
 0x1b0   :  { %1715 = vrot.lane.b32.xlu2 %v3725_v49, %s2875_s19  ;;  %v4140_v11 = vpop.permute.xlu1 %2145  ;;  %v2727_v49 = vld [vmem:[#allocation2 + $0xa8] sm:$0xff] }
 0x1b1   :  { %2247 = vrot.lane.b32.xlu1 %v1988_v51, %s2876_s0  ;;  %v1846_v16 = vsub.f32 %v2727_v49, %v4542_v0  ;;  %v4165_v51 = vpop.permute.xlu0 %1685 }
 0x1b3   :  { %v1942_v57 = vand.u32 2147483647, %v1846_v16  ;;  %v4545_v16 = vld [vmem:[#allocation32_spill] sm:$0xff] }
 0x1b6   :  { %2149 = vrot.lane.b32.xlu0 %v1939_v31, %s2876_s0  ;;  %v1994_v31 = vand.u32 2147483647, %v1898_v42  ;;  %v2738_v42 = vld [vmem:[#allocation2 + $0x270] sm:$0xff] }
 0x1b8   :  { %2251 = vrot.lane.b32.xlu2 %v1990_v1, %s2876_s0  ;;  %v4152_v2 = vpop.permute.xlu1 %2151  ;;  %v4175_v1 = vpop.permute.xlu2 %2159 }
 0x1b9   :  { %1717 = vrot.lane.b32.xlu1 %v3732_v52, %s2875_s19  ;;  %v2729_v52 = vld [vmem:[#allocation2 + $0xc0] sm:$0xff] }
 0x1ba   :  { %v1849_v56 = vsub.f32 %v2729_v52, %v4543_v63 }
 0x1bc   :  { %v1945_v50 = vand.u32 2147483647, %v1849_v56  ;;  %v1997_v56 = vand.u32 2147483647, %v1901_v18 }
 0x1bd   :  { %s2661_s20 = spop %2660 }
 0x1be   :  { %v2602_v30 = vstv %s2661_s20  ;;  %2155 = vrot.lane.b32.xlu0 %v1942_v57, %s2876_s0 }
 0x1bf   :  { %2605 = vst.msk [vmem:[#allocation5] sm:$0x1] %vm2604_vm4, %v2602_v30 }
 0x1c0   :  { %1721 = vrot.lane.b32.xlu2 %v3751_v60, %s2875_s19  ;;  %v4163_v39 = vpop.permute.xlu1 %2157  ;;  %v2731_v60 = vld [vmem:[#allocation2 + $0xd8] sm:$0xff]  ;;  %2622 = dma.vmem_to_hbm [thread:$0]  %s2618_s4, 16, %s2620_s29, [#allocation4]  }
 0x1c1   :  { %2253 = vrot.lane.b32.xlu1 %v1991_v14, %s2876_s0  ;;  %v1852_v7 = vsub.f32 %v2731_v60, %v4544_v27  ;;  %v2735_v14 = vld [vmem:[#allocation2 + $0x258] sm:$0xff] }
 0x1c2   :  { %v1900_v30 = vsub.f32 %v2735_v14, %v4048_v25  ;;  %v4546_v60 = vld [vmem:[#allocation34_spill] sm:$0xff] }
 0x1c3   :  { %v1948_v28 = vand.u32 2147483647, %v1852_v7  ;;  %v1858_v27 = vsub.f32 %v2736_v5, %v4546_v60  ;;  %v2737_v25 = vld [vmem:[#allocation2 + $0x278] sm:$0xff] }
 0x1c4   :  { %v1904_v7 = vsub.f32 %v2737_v25, %v4046_v38  ;;  %v2740_v38 = vld [vmem:[#allocation2 + $0x290] sm:$0xff] }
 0x1c5   :  { %v1907_v29 = vsub.f32 %v2740_v38, %v4058_v3 }
 0x1c6   :  { %2161 = vrot.lane.b32.xlu0 %v1945_v50, %s2876_s0  ;;  %v1996_v50 = vand.u32 2147483647, %v1900_v30 }
 0x1c8   :  { %2257 = vrot.lane.b32.xlu2 %v1993_v58, %s2876_s0  ;;  %v4173_v53 = vpop.permute.xlu1 %2163  ;;  %v4188_v58 = vpop.permute.xlu2 %2165 }
 0x1c9   :  { %1723 = vrot.lane.b32.xlu1 %v3769_v47, %s2875_s19  ;;  %v2733_v47 = vld [vmem:[#allocation2 + $0xf0] sm:$0xff] }
 0x1ca   :  { %v1855_v46 = vsub.f32 %v2733_v47, %v4545_v16  ;;  %v2739_v16 = vld [vmem:[#allocation2 + $0x120] sm:$0xff] }
 0x1cc   :  { %v1951_v63 = vand.u32 2147483647, %v1855_v46  ;;  %v1861_v46 = vsub.f32 %v2739_v16, %v3808_v6  ;;  %v2742_v6 = vld [vmem:[#allocation2 + $0x138] sm:$0xff] }
 0x1cd   :  { %v1529_v49 = vpop.xlane.xlu0 %1528  ;;  %v1864_v3 = vsub.f32 %v2742_v6, %v3829_v59  ;;  %v2745_v59 = vld [vmem:[#allocation2 + $0x150] sm:$0xff] }
 0x1ce   :  { %v1530_v0 = vrot.slane %v1529_v49, 4  ;;  %2167 = vrot.lane.b32.xlu0 %v1948_v28, %s2876_s0  ;;  %v1903_v28 = vsub.f32 %v2738_v42, %v4060_v8  ;;  %v2741_v8 = vld [vmem:[#allocation2 + $0x288] sm:$0xff]  ;;  %v1957_v30 = vand.u32 2147483647, %v1861_v46  ;;  %v2403_v46 = vsel %vm2401_vm5, %v4091_v40, 0.0 }
 0x1d0   :  { %1727 = vrot.lane.b32.xlu2 %v4527_v44, %s2875_s19  ;;  %v1531_v57 = vadd.f32 %v1530_v0, %v1529_v49  ;;  %v4184_v32 = vpop.permute.xlu1 %2169  ;;  %v2000_v49 = vand.u32 2147483647, %v1904_v7  ;;  %v1999_v47 = vand.u32 2147483647, %v1903_v28  ;;  %v4204_v14 = vpop.permute.xlu2 %2171 }
 0x1d1   :  { %2259 = vrot.lane.b32.xlu1 %v1994_v31, %s2876_s0  ;;  %v1954_v31 = vand.u32 2147483647, %v1858_v27  ;;  %v1960_v27 = vand.u32 2147483647, %v1864_v3 }
 0x1d2   :  { %v1532_v52 = vrot.slane %v1531_v57, 2 }
 0x1d4   :  { %v1533_v15 = vadd.f32 %v1532_v52, %v1531_v57  ;;  %v1906_v57 = vsub.f32 %v2741_v8, %v4070_v19  ;;  %v2003_v52 = vand.u32 2147483647, %v1907_v29  ;;  %v2405_v29 = vsel %vm2401_vm5, %v4085_v20, 0.0 }
 0x1d6   :  { %2173 = vrot.lane.b32.xlu0 %v1951_v63, %s2876_s0  ;;  %v1534_v44 = vrot.slane %v1533_v15, 1 }
 0x1d8   :  { %2265 = vrot.lane.b32.xlu2 %v1997_v56, %s2876_s0  ;;  %v1535_v55 = vadd.f32 %v1534_v44, %v1533_v15  ;;  %v4194_v0 = vpop.permute.xlu1 %2175  ;;  %v2002_v56 = vand.u32 2147483647, %v1906_v57  ;;  %v2743_v15 = vld [vmem:[#allocation2 + $0x2a8] sm:$0xff]  ;;  %v2744_v44 = vld [vmem:[#allocation2 + $0x2a0] sm:$0xff]  ;;  %v4216_v60 = vpop.permute.xlu2 %2177 }
 0x1d9   :  { %2263 = vrot.lane.b32.xlu1 %v1996_v50, %s2876_s0  ;;  %v1910_v50 = vsub.f32 %v2743_v15, %v4072_v23  ;;  %v1909_v5 = vsub.f32 %v2744_v44, %v4081_v61  ;;  %v1867_v23 = vsub.f32 %v2745_v59, %v3845_v4  ;;  %v2409_v15 = vsel %vm2401_vm5, %v4101_v33, 0.0 }
 0x1da   :  { %2662 = vpush %v1535_v55  ;;  %v2415_v33 = vsel %vm2401_vm5, %v4110_v62, 0.0 }
 0x1db   :  { %v2006_v25 = vand.u32 2147483647, %v1910_v50  ;;  %v2005_v55 = vand.u32 2147483647, %v1909_v5  ;;  %v1963_v28 = vand.u32 2147483647, %v1867_v23 }
 0x1dc   :  { %v2411_v5 = vsel %vm2401_vm5, %v4099_v24, 0.0 }
 0x1de   :  { %2179 = vrot.lane.b32.xlu0 %v1954_v31, %s2876_s0 }
 0x1e0   :  { %2271 = vrot.lane.b32.xlu2 %v2000_v49, %s2876_s0  ;;  %v4201_v18 = vpop.permute.xlu0 %1691  ;;  %v4206_v63 = vpop.permute.xlu1 %2181  ;;  %v2746_v49 = vld [vmem:[#allocation2 + $0x168] sm:$0xff] }
 0x1e1   :  { %2269 = vrot.lane.b32.xlu1 %v1999_v47, %s2876_s0  ;;  %v4228_v31 = vpop.permute.xlu2 %2183  ;;  %v1870_v47 = vsub.f32 %v2746_v49, %v3863_v54  ;;  %v2747_v54 = vld [vmem:[#allocation2 + $0x180] sm:$0xff] }
 0x1e3   :  { %v1966_v8 = vand.u32 2147483647, %v1870_v47 }
 0x1e6   :  { %2185 = vrot.lane.b32.xlu0 %v1957_v30, %s2876_s0 }
 0x1e8   :  { %2277 = vrot.lane.b32.xlu2 %v2003_v52, %s2876_s0  ;;  %v4213_v19 = vpop.permute.xlu0 %1697  ;;  %v4218_v7 = vpop.permute.xlu1 %2187 }
 0x1e9   :  { %2275 = vrot.lane.b32.xlu1 %v2002_v56, %s2876_s0  ;;  %v4240_v52 = vpop.permute.xlu2 %2189  ;;  %v1873_v56 = vsub.f32 %v2747_v54, %v3890_v17 }
 0x1eb   :  { %v1969_v50 = vand.u32 2147483647, %v1873_v56 }
 0x1ee   :  { %2191 = vrot.lane.b32.xlu0 %v1960_v27, %s2876_s0 }
 0x1f0   :  { %2283 = vrot.lane.b32.xlu2 %v2006_v25, %s2876_s0  ;;  %v4224_v42 = vpop.permute.xlu0 %1703  ;;  %v4226_v61 = vpop.permute.xlu1 %2193  ;;  %v2748_v25 = vld [vmem:[#allocation2 + $0x198] sm:$0xff] }
 0x1f1   :  { %2281 = vrot.lane.b32.xlu1 %v2005_v55, %s2876_s0  ;;  %v1876_v17 = vsub.f32 %v2748_v25, %v3920_v41  ;;  %v4252_v59 = vpop.permute.xlu2 %2195 }
 0x1f3   :  { %v1972_v49 = vand.u32 2147483647, %v1876_v17 }
 0x1f6   :  { %2197 = vrot.lane.b32.xlu0 %v1963_v28, %s2876_s0 }
 0x1f8   :  { %v2114_v16 = vpop.permute.xlu0 %2113  ;;  %v4237_v30 = vpop.permute.xlu1 %2199 }
 0x1f9   :  { %v2402_v38 = vsel %vm2401_vm5, %v2114_v16, 0.0  ;;  %v4267_v54 = vpop.permute.xlu2 %2201 }
 0x1fa   :  { %v2404_v4 = vadd.f32 %v2403_v46, %v2402_v38  ;;  %v2417_v46 = vsel %vm2401_vm5, %v4108_v26, 0.0  ;;  %v2749_v38 = vld [vmem:[#allocation2 + $0x1b0] sm:$0xff] }
 0x1fc   :  { %v2406_v57 = vadd.f32 %v2405_v29, %v2404_v4  ;;  %v1879_v4 = vsub.f32 %v2749_v38, %v3953_v22  ;;  %v2750_v22 = vld [vmem:[#allocation2 + $0x1c8] sm:$0xff] }
 0x1fe   :  { %2203 = vrot.lane.b32.xlu0 %v1966_v8, %s2876_s0  ;;  %v1975_v56 = vand.u32 2147483647, %v1879_v4 }
 0x200   :  { %v2120_v6 = vpop.permute.xlu0 %2119  ;;  %v4246_v44 = vpop.permute.xlu1 %2205 }
 0x201   :  { %v2407_v40 = vsel %vm2401_vm5, %v2120_v6, 0.0 }
 0x202   :  { %v2408_v3 = vadd.f32 %v2407_v40, %v2406_v57  ;;  %v2421_v57 = vsel %vm2401_vm5, %v4118_v48, 0.0  ;;  %v2423_v40 = vsel %vm2401_vm5, %v4120_v37, 0.0  ;;  %v2427_v48 = vsel %vm2401_vm5, %v4128_v43, 0.0 }
 0x203   :  { %v2429_v37 = vsel %vm2401_vm5, %v4133_v34, 0.0  ;;  %v2433_v43 = vsel %vm2401_vm5, %v4140_v11, 0.0  ;;  %v2435_v34 = vsel %vm2401_vm5, %v4148_v36, 0.0  ;;  %v2439_v11 = vsel %vm2401_vm5, %v4152_v2, 0.0 }
 0x204   :  { %v2410_v20 = vadd.f32 %v2409_v15, %v2408_v3  ;;  %v1882_v15 = vsub.f32 %v2750_v22, %v3975_v35  ;;  %v2751_v35 = vld [vmem:[#allocation2 + $0x1e0] sm:$0xff]  ;;  %v2441_v36 = vsel %vm2401_vm5, %v4161_v13, 0.0  ;;  %v2753_v22 = vld [vmem:[#allocation2 + $0x208] sm:$0xff]  ;;  %v2445_v2 = vsel %vm2401_vm5, %v4163_v39, 0.0 }
 0x205   :  { %v2447_v13 = vsel %vm2401_vm5, %v4175_v1, 0.0 }
 0x206   :  { %v2412_v27 = vadd.f32 %v2411_v5, %v2410_v20  ;;  %2209 = vrot.lane.b32.xlu0 %v1969_v50, %s2876_s0 }
 0x208   :  { %v2126_v55 = vpop.permute.xlu0 %2125  ;;  %v4257_v24 = vpop.permute.xlu1 %2211 }
 0x209   :  { %v2413_v23 = vsel %vm2401_vm5, %v2126_v55, 0.0  ;;  %v4282_v55 = vpop.permute.xlu2 %2207 }
 0x20a   :  { %v2414_v28 = vadd.f32 %v2413_v23, %v2412_v27  ;;  %v1978_v27 = vand.u32 2147483647, %v1882_v15 }
 0x20b   :  { %s2663_s21 = spop %2662 }
 0x20c   :  { %v2416_v47 = vadd.f32 %v2415_v33, %v2414_v28  ;;  %v2606_v16 = vstv %s2663_s21  ;;  %v1885_v28 = vsub.f32 %v2751_v35, %v3994_v9  ;;  %v2752_v9 = vld [vmem:[#allocation2 + $0x1f8] sm:$0xff] }
 0x20d   :  { %2608 = vst.msk [vmem:[#allocation6] sm:$0x1] %vm2604_vm4, %v2606_v16 }
 0x20e   :  { %v2418_v41 = vadd.f32 %v2417_v46, %v2416_v47  ;;  %2215 = vrot.lane.b32.xlu0 %v1972_v49, %s2876_s0  ;;  %v1981_v16 = vand.u32 2147483647, %v1885_v28  ;;  %v2451_v28 = vsel %vm2401_vm5, %v4173_v53, 0.0  ;;  %2633 = dma.vmem_to_hbm [thread:$0]  %s2629_s23, 16, %s2631_s26, [#allocation7]  }
 0x210   :  { %v2132_v29 = vpop.permute.xlu0 %2131  ;;  %v4269_v26 = vpop.permute.xlu1 %2217 }
 0x211   :  { %v2419_v62 = vsel %vm2401_vm5, %v2132_v29, 0.0  ;;  %v4294_v4 = vpop.permute.xlu2 %2213  ;;  %v1888_v29 = vsub.f32 %v2752_v9, %v4006_v21  ;;  %v1890_v21 = vsub.f32 %v2753_v22, %v4065_v45 }
 0x212   :  { %v2420_v8 = vadd.f32 %v2419_v62, %v2418_v41 }
 0x214   :  { %v2422_v6 = vadd.f32 %v2421_v57, %v2420_v8 }
 0x216   :  { %v2424_v3 = vadd.f32 %v2423_v40, %v2422_v6  ;;  %2221 = vrot.lane.b32.xlu0 %v1975_v56, %s2876_s0  ;;  %v1984_v56 = vand.u32 2147483647, %v1888_v29 }
 0x218   :  { %v2138_v50 = vpop.permute.xlu0 %2137  ;;  %v4278_v17 = vpop.permute.xlu1 %2223 }
 0x219   :  { %v2425_v20 = vsel %vm2401_vm5, %v2138_v50, 0.0  ;;  %v4306_v50 = vpop.permute.xlu2 %2219 }
 0x21a   :  { %v2426_v5 = vadd.f32 %v2425_v20, %v2424_v3 }
 0x21c   :  { %v2428_v25 = vadd.f32 %v2427_v48, %v2426_v5  ;;  %v1986_v48 = vand.u32 2147483647, %v1890_v21  ;;  %v2463_v21 = vsel %vm2401_vm5, %v4194_v0, 0.0 }
 0x21e   :  { %v2430_v23 = vadd.f32 %v2429_v37, %v2428_v25  ;;  %2227 = vrot.lane.b32.xlu0 %v1978_v27, %s2876_s0 }
 0x220   :  { %v2144_v33 = vpop.permute.xlu0 %2143  ;;  %v4289_v41 = vpop.permute.xlu1 %2229 }
 0x221   :  { %v2431_v49 = vsel %vm2401_vm5, %v2144_v33, 0.0  ;;  %v4319_v33 = vpop.permute.xlu2 %2225 }
 0x222   :  { %v2432_v47 = vadd.f32 %v2431_v49, %v2430_v23 }
 0x224   :  { %v2434_v46 = vadd.f32 %v2433_v43, %v2432_v47  ;;  %v2453_v47 = vsel %vm2401_vm5, %v4188_v58, 0.0  ;;  %v2754_v43 = vld [vmem:[#allocation2 + $0x2b8] sm:$0xff]  ;;  %v2457_v58 = vsel %vm2401_vm5, %v4184_v32, 0.0 }
 0x226   :  { %v2436_v38 = vadd.f32 %v2435_v34, %v2434_v46  ;;  %2233 = vrot.lane.b32.xlu0 %v1981_v16, %s2876_s0  ;;  %v4323_v46 = vld [vmem:[#allocation2 + $0x2c0] sm:$0xff] }
 0x228   :  { %v2150_v62 = vpop.permute.xlu0 %2149  ;;  %v4300_v40 = vpop.permute.xlu1 %2235 }
 0x229   :  { %v2437_v8 = vsel %vm2401_vm5, %v2150_v62, 0.0 }
 0x22a   :  { %v2438_v57 = vadd.f32 %v2437_v8, %v2436_v38  ;;  %v2756_v38 = vld [vmem:[#allocation2 + $0x220] sm:$0xff] }
 0x22b   :  { %v1893_v9 = vsub.f32 %v2756_v38, %v4138_v12  ;;  %v2475_v38 = vsel %vm2401_vm5, %v4218_v7, 0.0 }
 0x22c   :  { %v2440_v6 = vadd.f32 %v2439_v11, %v2438_v57 }
 0x22d   :  { %v1989_v8 = vand.u32 2147483647, %v1893_v9 }
 0x22e   :  { %v2442_v3 = vadd.f32 %v2441_v36, %v2440_v6  ;;  %2239 = vrot.lane.b32.xlu0 %v1984_v56, %s2876_s0  ;;  %v2459_v56 = vsel %vm2401_vm5, %v4204_v14, 0.0  ;;  %v4336_v6 = vpop.permute.xlu2 %2231  ;;  %v4344_v14 = vld [vmem:[#allocation2 + $0x2d8] sm:$0xff] }
 0x230   :  { %v2156_v15 = vpop.permute.xlu0 %2155  ;;  %v4311_v25 = vpop.permute.xlu1 %2241 }
 0x231   :  { %v2443_v20 = vsel %vm2401_vm5, %v2156_v15, 0.0 }
 0x232   :  { %v2444_v5 = vadd.f32 %v2443_v20, %v2442_v3  ;;  %v2465_v20 = vsel %vm2401_vm5, %v4216_v60, 0.0 }
 0x234   :  { %v2446_v27 = vadd.f32 %v2445_v2, %v2444_v5  ;;  %v2757_v5 = vld [vmem:[#allocation2 + $0x2d0] sm:$0xff] }
 0x236   :  { %v2448_v37 = vadd.f32 %v2447_v13, %v2446_v27  ;;  %2243 = vrot.lane.b32.xlu0 %v1986_v48, %s2876_s0  ;;  %v4348_v27 = vpop.permute.xlu2 %2237 }
 0x238   :  { %v2162_v45 = vpop.permute.xlu0 %2161  ;;  %v1712_v49 = vpop.permute.xlu1 %1711 }
 0x239   :  { %v2449_v23 = vsel %vm2401_vm5, %v2162_v45, 0.0  ;;  %v1912_v16 = vsub.f32 %v2754_v43, %v1712_v49 }
 0x23a   :  { %v2450_v35 = vadd.f32 %v2449_v23, %v2448_v37  ;;  %v2759_v37 = vld [vmem:[#allocation2 + $0x238] sm:$0xff] }
 0x23b   :  { %v2008_v34 = vand.u32 2147483647, %v1912_v16  ;;  %v1896_v45 = vsub.f32 %v2759_v37, %v4150_v10 }
 0x23c   :  { %v2452_v39 = vadd.f32 %v2451_v28, %v2450_v35  ;;  %v2469_v35 = vsel %vm2401_vm5, %v4206_v63, 0.0 }
 0x23d   :  { %2287 = vrot.lane.b32.xlu1 %v2008_v34, %s2876_s0  ;;  %v1992_v28 = vand.u32 2147483647, %v1896_v45  ;;  %v2489_v45 = vsel %vm2401_vm5, %v4267_v54, 0.0 }
 0x23e   :  { %v2454_v1 = vadd.f32 %v2453_v47, %v2452_v39  ;;  %1713 = vrot.lane.b32.xlu0 %v4323_v46, %s2875_s19  ;;  %v2471_v47 = vsel %vm2401_vm5, %v4228_v31, 0.0  ;;  %v4360_v16 = vpop.permute.xlu2 %1709  ;;  %v4367_v31 = vld [vmem:[#allocation2 + $0x2f0] sm:$0xff] }
 0x240   :  { %v2168_v53 = vpop.permute.xlu0 %2167  ;;  %v4332_v11 = vpop.permute.xlu1 %2247 }
 0x241   :  { %v2455_v29 = vsel %vm2401_vm5, %v2168_v53, 0.0  ;;  %v2477_v53 = vsel %vm2401_vm5, %v4240_v52, 0.0  ;;  %v2481_v52 = vsel %vm2401_vm5, %v4226_v61, 0.0  ;;  %v2487_v61 = vsel %vm2401_vm5, %v4237_v30, 0.0 }
 0x242   :  { %v2456_v62 = vadd.f32 %v2455_v29, %v2454_v1  ;;  %v2760_v29 = vld [vmem:[#allocation2 + $0x2e8] sm:$0xff] }
 0x244   :  { %v2458_v57 = vadd.f32 %v2457_v58, %v2456_v62 }
 0x246   :  { %2249 = vrot.lane.b32.xlu0 %v1989_v8, %s2876_s0  ;;  %v2460_v12 = vadd.f32 %v2459_v56, %v2458_v57  ;;  %v2762_v57 = vld [vmem:[#allocation2 + $0x250] sm:$0xff] }
 0x247   :  { %v1899_v56 = vsub.f32 %v2762_v57, %v4165_v51  ;;  %v2763_v51 = vld [vmem:[#allocation2 + $0x268] sm:$0xff] }
 0x248   :  { %v2174_v36 = vpop.permute.xlu0 %2173  ;;  %v1718_v15 = vpop.permute.xlu1 %1717 }
 0x249   :  { %v2461_v3 = vsel %vm2401_vm5, %v2174_v36, 0.0  ;;  %v1915_v2 = vsub.f32 %v2757_v5, %v1718_v15 }
 0x24a   :  { %v2462_v22 = vadd.f32 %v2461_v3, %v2460_v12  ;;  %v4376_v3 = vpop.permute.xlu2 %2245 }
 0x24b   :  { %v2011_v13 = vand.u32 2147483647, %v1915_v2 }
 0x24c   :  { %v2464_v32 = vadd.f32 %v2463_v21, %v2462_v22  ;;  %v1995_v22 = vand.u32 2147483647, %v1899_v56 }
 0x24d   :  { %2293 = vrot.lane.b32.xlu1 %v2011_v13, %s2876_s0 }
 0x24e   :  { %1719 = vrot.lane.b32.xlu0 %v4344_v14, %s2875_s19  ;;  %v2466_v48 = vadd.f32 %v2465_v20, %v2464_v32  ;;  %v2483_v32 = vsel %vm2401_vm5, %v4252_v59, 0.0  ;;  %v1902_v20 = vsub.f32 %v2763_v51, %v4201_v18  ;;  %v2511_v51 = vsel %vm2401_vm5, %v4278_v17, 0.0 }
 0x24f   :  { %v2519_v17 = vsel %vm2401_vm5, %v4336_v6, 0.0 }
 0x250   :  { %v2180_v0 = vpop.permute.xlu0 %2179  ;;  %v4355_v49 = vpop.permute.xlu1 %2253  ;;  %v1998_v13 = vand.u32 2147483647, %v1902_v20 }
 0x251   :  { %v2467_v23 = vsel %vm2401_vm5, %v2180_v0, 0.0 }
 0x252   :  { %v2468_v60 = vadd.f32 %v2467_v23, %v2466_v48  ;;  %v1716_v0 = vpop.permute.xlu2 %1715  ;;  %v2764_v23 = vld [vmem:[#allocation2 + $0x280] sm:$0xff] }
 0x254   :  { %v2470_v39 = vadd.f32 %v2469_v35, %v2468_v60  ;;  %v1905_v60 = vsub.f32 %v2764_v23, %v4213_v19 }
 0x256   :  { %2255 = vrot.lane.b32.xlu0 %v1992_v28, %s2876_s0  ;;  %v2472_v43 = vadd.f32 %v2471_v47, %v2470_v39  ;;  %v2493_v39 = vsel %vm2401_vm5, %v4246_v44, 0.0  ;;  %v2001_v30 = vand.u32 2147483647, %v1905_v60  ;;  %v2499_v44 = vsel %vm2401_vm5, %v4257_v24, 0.0  ;;  %v2769_v60 = vld [vmem:[#allocation2 + $0x2f8] sm:$0xff] }
 0x257   :  { %v2505_v24 = vsel %vm2401_vm5, %v4269_v26, 0.0  ;;  %v2513_v26 = vsel %vm2401_vm5, %v4319_v33, 0.0 }
 0x258   :  { %v2186_v10 = vpop.permute.xlu0 %2185  ;;  %v1724_v9 = vpop.permute.xlu1 %1723 }
 0x259   :  { %v2473_v1 = vsel %vm2401_vm5, %v2186_v10, 0.0  ;;  %v1918_v62 = vsub.f32 %v2760_v29, %v1724_v9  ;;  %v2766_v29 = vld [vmem:[#allocation2 + $0x2b0] sm:$0xff] }
 0x25a   :  { %v2474_v34 = vadd.f32 %v2473_v1, %v2472_v43  ;;  %v2495_v43 = vsel %vm2401_vm5, %v4282_v55, 0.0  ;;  %v4395_v10 = vpop.permute.xlu2 %2251  ;;  %v2765_v1 = vld [vmem:[#allocation2 + $0x298] sm:$0xff]  ;;  %v2501_v55 = vsel %vm2401_vm5, %v4294_v4, 0.0  ;;  %v2767_v4 = vld [vmem:[#allocation2 + $0x2c8] sm:$0xff] }
 0x25b   :  { %v2014_v8 = vand.u32 2147483647, %v1918_v62  ;;  %v1908_v19 = vsub.f32 %v2765_v1, %v4224_v42  ;;  %v1911_v62 = vsub.f32 %v2766_v29, %v4360_v16 }
 0x25c   :  { %v2476_v63 = vadd.f32 %v2475_v38, %v2474_v34 }
 0x25d   :  { %2299 = vrot.lane.b32.xlu1 %v2014_v8, %s2876_s0  ;;  %v2004_v9 = vand.u32 2147483647, %v1908_v19  ;;  %v2007_v56 = vand.u32 2147483647, %v1911_v62 }
 0x25e   :  { %1725 = vrot.lane.b32.xlu0 %v4367_v31, %s2875_s19  ;;  %v2478_v58 = vadd.f32 %v2477_v53, %v2476_v63 }
 0x260   :  { %v2192_v12 = vpop.permute.xlu0 %2191 }
 0x261   :  { %v2479_v7 = vsel %vm2401_vm5, %v2192_v12, 0.0 }
 0x262   :  { %v2480_v36 = vadd.f32 %v2479_v7, %v2478_v58  ;;  %v1722_v42 = vpop.permute.xlu2 %1721 }
 0x264   :  { %v2482_v21 = vadd.f32 %v2481_v52, %v2480_v36  ;;  %v2507_v36 = vsel %vm2401_vm5, %v4306_v50, 0.0  ;;  %v1914_v52 = vsub.f32 %v2767_v4, %v1716_v0  ;;  %v2517_v0 = vsel %vm2401_vm5, %v4289_v41, 0.0 }
 0x265   :  { %v2525_v41 = vsel %vm2401_vm5, %v4348_v27, 0.0  ;;  %v2535_v27 = vsel %vm2401_vm5, %v4332_v11, 0.0 }
 0x266   :  { %2261 = vrot.lane.b32.xlu0 %v1995_v22, %s2876_s0  ;;  %v2484_v15 = vadd.f32 %v2483_v32, %v2482_v21  ;;  %v2010_v32 = vand.u32 2147483647, %v1914_v52 }
 0x268   :  { %v2198_v5 = vpop.permute.xlu0 %2197 }
 0x269   :  { %v2485_v2 = vsel %vm2401_vm5, %v2198_v5, 0.0 }
 0x26a   :  { %v2486_v48 = vadd.f32 %v2485_v2, %v2484_v15  ;;  %v2258_v20 = vpop.permute.xlu2 %2257  ;;  %v2768_v2 = vld [vmem:[#allocation2 + $0x2e0] sm:$0xff] }
 0x26b   :  { %v1917_v50 = vsub.f32 %v2768_v2, %v1722_v42  ;;  %v2545_v52 = vsel %vm2401_vm5, %v2258_v20, 0.0 }
 0x26c   :  { %v2488_v37 = vadd.f32 %v2487_v61, %v2486_v48 }
 0x26e   :  { %2267 = vrot.lane.b32.xlu0 %v1998_v13, %s2876_s0  ;;  %v2490_v59 = vadd.f32 %v2489_v45, %v2488_v37  ;;  %v2013_v37 = vand.u32 2147483647, %v1917_v50 }
 0x270   :  { %v2204_v18 = vpop.permute.xlu0 %2203 }
 0x271   :  { %v2491_v35 = vsel %vm2401_vm5, %v2204_v18, 0.0 }
 0x272   :  { %v2492_v28 = vadd.f32 %v2491_v35, %v2490_v59  ;;  %v1728_v23 = vpop.permute.xlu2 %1727 }
 0x273   :  { %v1920_v33 = vsub.f32 %v2769_v60, %v1728_v23 }
 0x274   :  { %v2494_v47 = vadd.f32 %v2493_v39, %v2492_v28 }
 0x275   :  { %v2016_v39 = vand.u32 2147483647, %v1920_v33 }
 0x276   :  { %2273 = vrot.lane.b32.xlu0 %v2001_v30, %s2876_s0  ;;  %v2496_v54 = vadd.f32 %v2495_v43, %v2494_v47  ;;  %v2523_v47 = vsel %vm2401_vm5, %v4300_v40, 0.0  ;;  %v2533_v40 = vsel %vm2401_vm5, %v4376_v3, 0.0  ;;  %v2541_v3 = vsel %vm2401_vm5, %v4355_v49, 0.0  ;;  %v2260_v49 = vpop.permute.xlu1 %2259 }
 0x278   :  { %v2210_v34 = vpop.permute.xlu0 %2209 }
 0x279   :  { %v2497_v38 = vsel %vm2401_vm5, %v2210_v34, 0.0  ;;  %v2529_v34 = vsel %vm2401_vm5, %v4311_v25, 0.0 }
 0x27a   :  { %v2498_v63 = vadd.f32 %v2497_v38, %v2496_v54  ;;  %v2266_v2 = vpop.permute.xlu2 %2265 }
 0x27c   :  { %v2500_v53 = vadd.f32 %v2499_v44, %v2498_v63 }
 0x27e   :  { %2279 = vrot.lane.b32.xlu0 %v2004_v9, %s2876_s0  ;;  %v2502_v58 = vadd.f32 %v2501_v55, %v2500_v53 }
 0x280   :  { %v2216_v8 = vpop.permute.xlu0 %2215 }
 0x281   :  { %v2503_v57 = vsel %vm2401_vm5, %v2216_v8, 0.0 }
 0x282   :  { %v2504_v12 = vadd.f32 %v2503_v57, %v2502_v58  ;;  %v2539_v57 = vsel %vm2401_vm5, %v4395_v10, 0.0 }
 0x284   :  { %v2506_v7 = vadd.f32 %v2505_v24, %v2504_v12 }
 0x286   :  { %2285 = vrot.lane.b32.xlu0 %v2007_v56, %s2876_s0  ;;  %v2508_v16 = vadd.f32 %v2507_v36, %v2506_v7 }
 0x288   :  { %v2222_v22 = vpop.permute.xlu0 %2221 }
 0x289   :  { %v2509_v21 = vsel %vm2401_vm5, %v2222_v22, 0.0 }
 0x28a   :  { %v2510_v15 = vadd.f32 %v2509_v21, %v2508_v16 }
 0x28c   :  { %v2512_v5 = vadd.f32 %v2511_v51, %v2510_v15 }
 0x28e   :  { %v2514_v48 = vadd.f32 %v2513_v26, %v2512_v5  ;;  %2291 = vrot.lane.b32.xlu0 %v2010_v32, %s2876_s0  ;;  %v2264_v5 = vpop.permute.xlu1 %2263 }
 0x28f   :  { %v2551_v50 = vsel %vm2401_vm5, %v2264_v5, 0.0 }
 0x290   :  { %v2228_v61 = vpop.permute.xlu0 %2227 }
 0x291   :  { %v2515_v13 = vsel %vm2401_vm5, %v2228_v61, 0.0  ;;  %v2553_v61 = vsel %vm2401_vm5, %v2266_v2, 0.0 }
 0x292   :  { %v2516_v45 = vadd.f32 %v2515_v13, %v2514_v48 }
 0x294   :  { %v2518_v59 = vadd.f32 %v2517_v0, %v2516_v45  ;;  %v2272_v0 = vpop.permute.xlu2 %2271 }
 0x295   :  { %v2559_v60 = vsel %vm2401_vm5, %v2272_v0, 0.0 }
 0x296   :  { %v2520_v18 = vadd.f32 %v2519_v17, %v2518_v59  ;;  %2297 = vrot.lane.b32.xlu0 %v2013_v37, %s2876_s0  ;;  %v2270_v37 = vpop.permute.xlu1 %2269 }
 0x297   :  { %v2557_v59 = vsel %vm2401_vm5, %v2270_v37, 0.0 }
 0x298   :  { %v2234_v35 = vpop.permute.xlu0 %2233 }
 0x299   :  { %v2521_v28 = vsel %vm2401_vm5, %v2234_v35, 0.0 }
 0x29a   :  { %v2522_v30 = vadd.f32 %v2521_v28, %v2520_v18 }
 0x29c   :  { %v2524_v43 = vadd.f32 %v2523_v47, %v2522_v30 }
 0x29e   :  { %v2526_v54 = vadd.f32 %v2525_v41, %v2524_v43  ;;  %2303 = vrot.lane.b32.xlu0 %v2016_v39, %s2876_s0  ;;  %v2276_v35 = vpop.permute.xlu1 %2275  ;;  %v2278_v39 = vpop.permute.xlu2 %2277 }
 0x29f   :  { %v2563_v30 = vsel %vm2401_vm5, %v2276_v35, 0.0  ;;  %v2565_v41 = vsel %vm2401_vm5, %v2278_v39, 0.0 }
 0x2a0   :  { %v2240_v6 = vpop.permute.xlu0 %2239 }
 0x2a1   :  { %v2527_v1 = vsel %vm2401_vm5, %v2240_v6, 0.0 }
 0x2a2   :  { %v2528_v19 = vadd.f32 %v2527_v1, %v2526_v54 }
 0x2a4   :  { %v2530_v38 = vadd.f32 %v2529_v34, %v2528_v19 }
 0x2a6   :  { %v2282_v1 = vpop.permute.xlu1 %2281  ;;  %v2284_v34 = vpop.permute.xlu2 %2283 }
 0x2a8   :  { %v2244_v63 = vpop.permute.xlu0 %2243 }
 0x2a9   :  { %v2531_v44 = vsel %vm2401_vm5, %v2244_v63, 0.0 }
 0x2aa   :  { %v2532_v9 = vadd.f32 %v2531_v44, %v2530_v38  ;;  %v2569_v38 = vsel %vm2401_vm5, %v2282_v1, 0.0 }
 0x2ac   :  { %v2534_v53 = vadd.f32 %v2533_v40, %v2532_v9  ;;  %v2571_v9 = vsel %vm2401_vm5, %v2284_v34, 0.0 }
 0x2ae   :  { %v2536_v55 = vadd.f32 %v2535_v27, %v2534_v53 }
 0x2af   :  { %v2288_v27 = vpop.permute.xlu1 %2287 }
 0x2b0   :  { %v1714_v29 = vpop.permute.xlu0 %1713 }
 0x2b1   :  { %v1913_v62 = vsub.f32 %v4323_v46, %v1714_v29 }
 0x2b3   :  { %v2009_v58 = vand.u32 2147483647, %v1913_v62  ;;  %v2575_v62 = vsel %vm2401_vm5, %v2288_v27, 0.0 }
 0x2b5   :  { %2289 = vrot.lane.b32.xlu2 %v2009_v58, %s2876_s0 }
 0x2b8   :  { %v2250_v25 = vpop.permute.xlu0 %2249 }
 0x2b9   :  { %v2537_v8 = vsel %vm2401_vm5, %v2250_v25, 0.0 }
 0x2ba   :  { %v2538_v42 = vadd.f32 %v2537_v8, %v2536_v55 }
 0x2bc   :  { %v2540_v56 = vadd.f32 %v2539_v57, %v2538_v42 }
 0x2be   :  { %v2542_v12 = vadd.f32 %v2541_v3, %v2540_v56 }
 0x2bf   :  { %v2294_v56 = vpop.permute.xlu1 %2293 }
 0x2c0   :  { %v1720_v11 = vpop.permute.xlu0 %1719 }
 0x2c1   :  { %v1916_v24 = vsub.f32 %v4344_v14, %v1720_v11  ;;  %v2547_v14 = vsel %vm2401_vm5, %v2260_v49, 0.0  ;;  %v2581_v11 = vsel %vm2401_vm5, %v2294_v56, 0.0 }
 0x2c3   :  { %v2012_v7 = vand.u32 2147483647, %v1916_v24 }
 0x2c5   :  { %2295 = vrot.lane.b32.xlu2 %v2012_v7, %s2876_s0 }
 0x2c8   :  { %v2256_v46 = vpop.permute.xlu0 %2255 }
 0x2c9   :  { %v2543_v36 = vsel %vm2401_vm5, %v2256_v46, 0.0 }
 0x2ca   :  { %v2544_v4 = vadd.f32 %v2543_v36, %v2542_v12 }
 0x2cc   :  { %v2546_v16 = vadd.f32 %v2545_v52, %v2544_v4 }
 0x2ce   :  { %v2548_v51 = vadd.f32 %v2547_v14, %v2546_v16 }
 0x2cf   :  { %v2300_v52 = vpop.permute.xlu1 %2299 }
 0x2d0   :  { %v1726_v22 = vpop.permute.xlu0 %1725 }
 0x2d1   :  { %v1919_v10 = vsub.f32 %v4367_v31, %v1726_v22  ;;  %v2587_v22 = vsel %vm2401_vm5, %v2300_v52, 0.0 }
 0x2d3   :  { %v2015_v21 = vand.u32 2147483647, %v1919_v10 }
 0x2d5   :  { %2301 = vrot.lane.b32.xlu2 %v2015_v21, %s2876_s0 }
 0x2d8   :  { %v2262_v32 = vpop.permute.xlu0 %2261 }
 0x2d9   :  { %v2549_v15 = vsel %vm2401_vm5, %v2262_v32, 0.0 }
 0x2da   :  { %v2550_v26 = vadd.f32 %v2549_v15, %v2548_v51 }
 0x2dc   :  { %v2552_v20 = vadd.f32 %v2551_v50, %v2550_v26 }
 0x2de   :  { %v2554_v13 = vadd.f32 %v2553_v61, %v2552_v20 }
 0x2e0   :  { %v2268_v48 = vpop.permute.xlu0 %2267 }
 0x2e1   :  { %v2555_v31 = vsel %vm2401_vm5, %v2268_v48, 0.0 }
 0x2e2   :  { %v2556_v45 = vadd.f32 %v2555_v31, %v2554_v13 }
 0x2e4   :  { %v2558_v17 = vadd.f32 %v2557_v59, %v2556_v45 }
 0x2e6   :  { %v2560_v18 = vadd.f32 %v2559_v60, %v2558_v17 }
 0x2e8   :  { %v2274_v23 = vpop.permute.xlu0 %2273 }
 0x2e9   :  { %v2561_v33 = vsel %vm2401_vm5, %v2274_v23, 0.0 }
 0x2ea   :  { %v2562_v28 = vadd.f32 %v2561_v33, %v2560_v18 }
 0x2ec   :  { %v2564_v47 = vadd.f32 %v2563_v30, %v2562_v28 }
 0x2ee   :  { %v2566_v6 = vadd.f32 %v2565_v41, %v2564_v47 }
 0x2f0   :  { %v2280_v43 = vpop.permute.xlu0 %2279 }
 0x2f1   :  { %v2567_v54 = vsel %vm2401_vm5, %v2280_v43, 0.0 }
 0x2f2   :  { %v2568_v19 = vadd.f32 %v2567_v54, %v2566_v6 }
 0x2f4   :  { %v2570_v63 = vadd.f32 %v2569_v38, %v2568_v19 }
 0x2f6   :  { %v2572_v53 = vadd.f32 %v2571_v9, %v2570_v63 }
 0x2f8   :  { %v2286_v44 = vpop.permute.xlu0 %2285 }
 0x2f9   :  { %v2573_v40 = vsel %vm2401_vm5, %v2286_v44, 0.0 }
 0x2fa   :  { %v2574_v55 = vadd.f32 %v2573_v40, %v2572_v53 }
 0x2fc   :  { %v2576_v25 = vadd.f32 %v2575_v62, %v2574_v55 }
 0x300   :  { %v2292_v8 = vpop.permute.xlu0 %2291 }
 0x301   :  { %v2579_v57 = vsel %vm2401_vm5, %v2292_v8, 0.0 }
 0x308   :  { %v2298_v46 = vpop.permute.xlu0 %2297 }
 0x309   :  { %v2585_v4 = vsel %vm2401_vm5, %v2298_v46, 0.0 }
 0x30f   :  { %v2290_v29 = vpop.permute.xlu2 %2289 }
 0x310   :  { %v2577_v58 = vsel %vm2401_vm5, %v2290_v29, 0.0  ;;  %v2304_v10 = vpop.permute.xlu0 %2303 }
 0x311   :  { %v2578_v42 = vadd.f32 %v2577_v58, %v2576_v25  ;;  %v2591_v14 = vsel %vm2401_vm5, %v2304_v10, 0.0 }
 0x313   :  { %v2580_v3 = vadd.f32 %v2579_v57, %v2578_v42 }
 0x315   :  { %v2582_v7 = vadd.f32 %v2581_v11, %v2580_v3 }
 0x31f   :  { %v2296_v12 = vpop.permute.xlu2 %2295 }
 0x320   :  { %v2583_v24 = vsel %vm2401_vm5, %v2296_v12, 0.0 }
 0x321   :  { %v2584_v36 = vadd.f32 %v2583_v24, %v2582_v7 }
 0x323   :  { %v2586_v16 = vadd.f32 %v2585_v4, %v2584_v36 }
 0x325   :  { %v2588_v21 = vadd.f32 %v2587_v22, %v2586_v16 }
 0x32f   :  { %v2302_v49 = vpop.permute.xlu2 %2301 }
 0x330   :  { %v2589_v32 = vsel %vm2401_vm5, %v2302_v49, 0.0 }
 0x331   :  { %v2590_v15 = vadd.f32 %v2589_v32, %v2588_v21 }
 0x333   :  { %v2592_v51 = vadd.f32 %v2591_v14, %v2590_v15 }
 0x335   :  { %2593 = vadd.xlane.f32.xlu1 %v2592_v51 }
 0x3a8   :  { %v2594_v5 = vpop.xlane.xlu1 %2593 }
 0x3a9   :  { %v2595_v26 = vrot.slane %v2594_v5, 4 }
 0x3ab   :  { %v2596_v2 = vadd.f32 %v2595_v26, %v2594_v5 }
 0x3ad   :  { %v2597_v50 = vrot.slane %v2596_v2, 2 }
 0x3af   :  { %v2598_v20 = vadd.f32 %v2597_v50, %v2596_v2 }
 0x3b1   :  { %v2599_v48 = vrot.slane %v2598_v20, 1 }
 0x3b3   :  { %v2600_v61 = vadd.f32 %v2599_v48, %v2598_v20 }
 0x3b5   :  { %2664 = vpush %v2600_v61 }
 0x3e6   :  { %s2665_s1 = spop %2664 }
 0x3e7   :  { %v2609_v31 = vstv %s2665_s1 }
 0x3e8   :  { %2611 = vst.msk [vmem:[#allocation8] sm:$0x1] %vm2604_vm4, %v2609_v31 }
 0x3e9   :  { %2644 = dma.vmem_to_hbm [thread:$0]  %s2640_s5, 16, %s2642_s8, [#allocation7]  }
 0x3ea   :  { %2868 = dma.done.wait [#allocation4], 16  }
 0x3eb   :  { %2869 = vsyncadd [#allocation4], 4294967280 }
 0x3ec   :  { %2870 = dma.done.wait [#allocation7], 32  }
 0x3ed   :  { %2871 = vsyncadd [#allocation7], 4294967264 }
 0x3ee   :  { %2657 = vsyncpa [#allocation3], 1 }
 0x3ef   :  { %2658 = vsyncpa [#allocation4], 1 }
 0x3f0   :  { %2659 = vsyncpa [#allocation7], 1 }

</bundles_post_ra>
